<compile_context>
chip_gen: v7x
topology: tpu7x:2x2x1
jax: 0.10.0
libtpu: 0.0.40
codegen_flags: <defaults>
</compile_context>

<pallas_src>
import math
from functools import partial

import jax
import jax.numpy as jnp
from jax.experimental import pallas as pl
from jax.experimental.pallas import tpu as pltpu

NEG_INF = -1e30  # causal-mask fill value (exp underflows to exactly 0)
LANE = 128       # TPU lane width: pad the tag dim to this for unmasked stores


def _layer_norm(x, g, b, eps=1e-5):
    mu = jnp.mean(x, axis=-1, keepdims=True)
    xc = x - mu
    var = jnp.mean(xc * xc, axis=-1, keepdims=True)
    return xc * jax.lax.rsqrt(var + eps) * g + b


def transformer_kernel(x_ref,
                       wqkv_ref, bqkv_ref,
                       wo_ref, bo_ref,
                       g1_ref, be1_ref,
                       w1_ref, bf1_ref, w2_ref, bf2_ref,
                       g2_ref, be2_ref,
                       wt_ref, bt_ref,
                       out_ref,
                       *, num_heads):
    BT, S, E = x_ref.shape
    H = num_heads
    hd = E // H
    scale = 1.0 / math.sqrt(hd)
    bf16 = jnp.bfloat16

    x = x_ref[...]                          # (BT, S, E) f32 (residual path is f32)
    x2d = x.reshape(BT * S, E)              # fold batch into the row dim

    # ---- fused QKV projection: one lane-dense matmul, N = 3E ----
    qkv = jnp.dot(x2d.astype(bf16), wqkv_ref[...],
                  preferred_element_type=jnp.float32) + bqkv_ref[...]

    q = ((qkv[:, :E] * scale).reshape(BT, S, E)).astype(bf16)
    k = (qkv[:, E:2 * E].reshape(BT, S, E)).astype(bf16)
    v = (qkv[:, 2 * E:].reshape(BT, S, E)).astype(bf16)

    # ---- causal mask, built once per grid step and fused via where ----
    row = jax.lax.broadcasted_iota(jnp.int32, (S, S), 0)
    col = jax.lax.broadcasted_iota(jnp.int32, (S, S), 1)
    causal = (col <= row)[None, :, :]       # (1, S, S), broadcasts over batch

    # ---- attention, per head (static lane slices; batched over BT) ----
    ctx_heads = []
    for h in range(H):                      # unrolled at trace time
        sl = slice(h * hd, (h + 1) * hd)
        qh = q[:, :, sl]                    # (BT, S, hd) bf16
        kh = k[:, :, sl]
        vh = v[:, :, sl]

        # scores: (BT,S,hd) x (BT,S,hd) -> (BT,S,S), f32 accumulation
        s = jax.lax.dot_general(qh, kh, (((2,), (2,)), ((0,), (0,))),
                                preferred_element_type=jnp.float32)
        s = jnp.where(causal, s, NEG_INF)
        s = s - jnp.max(s, axis=-1, keepdims=True)
        p = jnp.exp(s)
        p = p * pl.reciprocal(jnp.sum(p, axis=-1, keepdims=True), approx=True)

        # context: (BT,S,S) x (BT,S,hd) -> (BT,S,hd)
        ctx_heads.append(
            jax.lax.dot_general(p.astype(bf16), vh, (((2,), (1,)), ((0,), (0,))),
                                preferred_element_type=jnp.float32))

    # head-concat along lanes -> ctx_flat (rows, H*hd); matches out_proj layout
    ctx2d = jnp.concatenate(ctx_heads, axis=-1).reshape(BT * S, E)

    # ---- fused output projection: single K=E matmul (no per-head sum) ----
    attn = jnp.dot(ctx2d.astype(bf16), wo_ref[...],
                   preferred_element_type=jnp.float32) + bo_ref[...]

    # ---- add & norm 1 (post-norm, PyTorch default), f32 ----
    y = _layer_norm(x2d + attn, g1_ref[...], be1_ref[...])

    # ---- feed-forward (ReLU), dim_feedforward=1024 ----
    h1 = jnp.dot(y.astype(bf16), w1_ref[...],
                 preferred_element_type=jnp.float32) + bf1_ref[...]
    h1 = jnp.maximum(h1, 0.0)
    ff = jnp.dot(h1.astype(bf16), w2_ref[...],
                 preferred_element_type=jnp.float32) + bf2_ref[...]

    # ---- add & norm 2 ----
    y = _layer_norm(y + ff, g2_ref[...], be2_ref[...])

    # ---- hidden_to_tag (tag dim padded to LANE multiple -> unmasked store) ----
    out = jnp.dot(y.astype(bf16), wt_ref[...],
                  preferred_element_type=jnp.float32) + bt_ref[...]
    out_ref[...] = out.reshape(BT, S, out_ref.shape[2])


def prepare_kernel_params(params, *, num_heads=8):
    """One-time conversion of PyTorch-convention params to kernel layout
    (pre-transposed, bf16 MXU weights, padded tag dim)."""
    del num_heads  # head split is done with static lane slices in the kernel
    E = params["embedding"].shape[1]
    T = params["wt"].shape[0]
    TP = max(LANE, ((T + LANE - 1) // LANE) * LANE)
    bf16 = jnp.bfloat16
    f32 = jnp.float32

    wt_pad = jnp.zeros((E, TP), f32).at[:, :T].set(params["wt"].T)
    bt_pad = jnp.zeros((1, TP), f32).at[:, :T].set(params["bt"])

    return {
        "embedding": params["embedding"].astype(f32),
        # fused in_proj: (E, 3E), columns = [q | k | v]
        "wqkv": params["wqkv"].T.astype(bf16),
        "bqkv": params["bqkv"].astype(f32),            # (1, 3E)
        # out_proj: (H*hd, E) -- head-concat order along the contraction dim
        "wo": params["wo"].T.astype(bf16),
        "bo": params["bo"].astype(f32),
        "g1": params["g1"].astype(f32), "be1": params["be1"].astype(f32),
        "w1": params["w1"].T.astype(bf16), "bf1": params["bf1"].astype(f32),
        "w2": params["w2"].T.astype(bf16), "bf2": params["bf2"].astype(f32),
        "g2": params["g2"].astype(f32), "be2": params["be2"].astype(f32),
        "wt_pad": wt_pad.astype(bf16), "bt_pad": bt_pad,
        "nb_tags": T,
    }


def _pick_block_batch(B):
    """Fold batch into each grid step, but keep >=2 steps when B >= 2 so both
    v7x TensorCores get work (on v5e/v6e fewer, fatter steps is strictly better)."""
    if B >= 2 and B % 2 == 0:
        return B // 2
    return 1


def transformer_forward(token_ids, kparams, *, num_heads=8, block_batch=None):
    """token_ids: (S, B) int32. Returns (S, B, nb_tags) f32 (PyTorch convention)."""
    S, B = token_ids.shape
    emb = kparams["embedding"]
    E = emb.shape[1]
    T = kparams["nb_tags"]
    TP = kparams["wt_pad"].shape[1]

    if block_batch is None:
        block_batch = _pick_block_batch(B)
    assert B % block_batch == 0, (B, block_batch)
    grid = B // block_batch

    # glue: embedding gather directly in (B, S, E) layout
    x = jnp.take(emb, token_ids.T, axis=0).astype(jnp.float32)      # (B, S, E)

    weights = (kparams["wqkv"], kparams["bqkv"],
               kparams["wo"], kparams["bo"],
               kparams["g1"], kparams["be1"],
               kparams["w1"], kparams["bf1"], kparams["w2"], kparams["bf2"],
               kparams["g2"], kparams["be2"],
               kparams["wt_pad"], kparams["bt_pad"])

    in_specs = [pl.BlockSpec((block_batch, S, E), lambda b: (b, 0, 0))]
    for w in weights:  # full-shape blocks, constant index maps -> stay resident
        in_specs.append(pl.BlockSpec(w.shape, lambda b, nd=w.ndim: (0,) * nd))

    out = pl.pallas_call(
        partial(transformer_kernel, num_heads=num_heads),
        out_shape=jax.ShapeDtypeStruct((B, S, TP), jnp.float32),
        grid=(grid,),
        in_specs=in_specs,
        out_specs=pl.BlockSpec((block_batch, S, TP), lambda b: (b, 0, 0)),
        compiler_params=pltpu.CompilerParams(
            dimension_semantics=("parallel",),
            vmem_limit_bytes=32 * 1024 * 1024),
    )(x, *weights)

    # slice away tag padding, back to PyTorch's seq-first layout
    return jnp.transpose(out[:, :, :T], (1, 0, 2))                  # (S, B, nb_tags)


def init_params(key, nb_tags, emb_dim, dff=1024):
    """PyTorch-convention parameters (out_features, in_features)."""
    E = emb_dim
    ks = jax.random.split(key, 10)

    def w(k, shape, scale=0.05):
        return (scale * jax.random.normal(k, shape)).astype(jnp.float32)

    return {
        "embedding": w(ks[0], (nb_tags, E), 0.1),
        # MultiheadAttention in_proj / out_proj
        "wqkv": w(ks[1], (3 * E, E)), "bqkv": w(ks[2], (1, 3 * E), 0.02),
        "wo": w(ks[3], (E, E)), "bo": w(ks[4], (1, E), 0.02),
        # LayerNorms
        "g1": jnp.ones((1, E), jnp.float32), "be1": jnp.zeros((1, E), jnp.float32),
        "g2": jnp.ones((1, E), jnp.float32), "be2": jnp.zeros((1, E), jnp.float32),
        # feed-forward (dim_feedforward=1024)
        "w1": w(ks[5], (dff, E)), "bf1": w(ks[6], (1, dff), 0.02),
        "w2": w(ks[7], (E, dff)), "bf2": w(ks[8], (1, E), 0.02),
        # hidden_to_tag
        "wt": w(ks[9], (nb_tags, E)), "bt": jnp.zeros((1, nb_tags), jnp.float32),
    }


def reference_forward(token_ids, params, num_heads=8):
    """Pure-jnp f32 reference mirroring PyTorch semantics (seq-first)."""
    S, B = token_ids.shape
    E = params["embedding"].shape[1]
    H, hd = num_heads, E // num_heads

    x = jnp.take(params["embedding"], token_ids, axis=0).astype(jnp.float32)  # (S,B,E)
    row = jnp.arange(S)[:, None]
    col = jnp.arange(S)[None, :]
    mask = jnp.where(col <= row, 0.0, NEG_INF).astype(jnp.float32)

    qkv = jnp.einsum('sbe,fe->sbf', x, params["wqkv"]) + params["bqkv"][0]
    q, k, v = jnp.split(qkv, 3, axis=-1)
    q = q.reshape(S, B, H, hd) / jnp.sqrt(hd)
    k = k.reshape(S, B, H, hd)
    v = v.reshape(S, B, H, hd)
    scores = jnp.einsum('sbhd,tbhd->bhst', q, k) + mask
    p = jax.nn.softmax(scores, axis=-1)
    ctx = jnp.einsum('bhst,tbhd->sbhd', p, v).reshape(S, B, E)
    attn = jnp.einsum('sbe,fe->sbf', ctx, params["wo"]) + params["bo"][0]

    y = _layer_norm(x + attn, params["g1"][0], params["be1"][0])
    h1 = jax.nn.relu(jnp.einsum('sbe,fe->sbf', y, params["w1"]) + params["bf1"][0])
    ff = jnp.einsum('sbf,ef->sbe', h1, params["w2"]) + params["bf2"][0]
    y = _layer_norm(y + ff, params["g2"][0], params["be2"][0])
    return jnp.einsum('sbe,te->sbt', y, params["wt"]) + params["bt"][0]


if __name__ == "__main__":
    NB_TAGS, EMB_DIM, SEQ, BATCH = 16, 32, 8, 2   # emb_dim divisible by nhead=8

    key = jax.random.PRNGKey(0)
    pkey, ikey = jax.random.split(key)
    params = init_params(pkey, NB_TAGS, EMB_DIM)
    kparams = prepare_kernel_params(params, num_heads=8)   # one-time layout prep
    token_ids = jax.random.randint(ikey, (SEQ, BATCH), 0, NB_TAGS, dtype=jnp.int32)

    out = transformer_forward(token_ids, kparams)
    out = jax.block_until_ready(out)
    assert out.shape == (SEQ, BATCH, NB_TAGS)

    ref = reference_forward(token_ids, params)
    max_err = float(jnp.max(jnp.abs(out - ref)))
    # bf16 MXU inputs vs f32 reference -> relaxed tolerance
    assert jnp.allclose(out, ref, rtol=2e-2, atol=2e-2), f"mismatch, max abs err {max_err}"

    print("KERNEL_OK")
</pallas_src>

<mosaic_0001>
module attributes {stable_mosaic.version = 11 : i64} {
  func.func @transformer_kernel(%arg0: i32, %arg1: memref<1x8x32xf32, #tpu.memory_space<vmem>>, %arg2: memref<32x96xbf16, #tpu.memory_space<vmem>>, %arg3: memref<1x96xf32, #tpu.memory_space<vmem>>, %arg4: memref<32x32xbf16, #tpu.memory_space<vmem>>, %arg5: memref<1x32xf32, #tpu.memory_space<vmem>>, %arg6: memref<1x32xf32, #tpu.memory_space<vmem>>, %arg7: memref<1x32xf32, #tpu.memory_space<vmem>>, %arg8: memref<32x1024xbf16, #tpu.memory_space<vmem>>, %arg9: memref<1x1024xf32, #tpu.memory_space<vmem>>, %arg10: memref<1024x32xbf16, #tpu.memory_space<vmem>>, %arg11: memref<1x32xf32, #tpu.memory_space<vmem>>, %arg12: memref<1x32xf32, #tpu.memory_space<vmem>>, %arg13: memref<1x32xf32, #tpu.memory_space<vmem>>, %arg14: memref<32x128xbf16, #tpu.memory_space<vmem>>, %arg15: memref<1x128xf32, #tpu.memory_space<vmem>>, %arg16: memref<1x8x128xf32, #tpu.memory_space<vmem>>) attributes {dimension_semantics = [#tpu.dimension_semantics<parallel>], iteration_bounds = array<i64: 2>, scalar_prefetch = 0 : i64, scratch_operands = 0 : i64, tpu.core_type = #tpu.core_type<tc>, window_params = [{transform_indices = @transform_0, window_bounds = array<i64: 1, 8, 32>}, {pipeline_mode = #tpu.pipeline_mode<synchronous>, transform_indices = @transform_1, window_bounds = array<i64: 32, 96>}, {pipeline_mode = #tpu.pipeline_mode<synchronous>, transform_indices = @transform_2, window_bounds = array<i64: 1, 96>}, {pipeline_mode = #tpu.pipeline_mode<synchronous>, transform_indices = @transform_3, window_bounds = array<i64: 32, 32>}, {pipeline_mode = #tpu.pipeline_mode<synchronous>, transform_indices = @transform_4, window_bounds = array<i64: 1, 32>}, {pipeline_mode = #tpu.pipeline_mode<synchronous>, transform_indices = @transform_5, window_bounds = array<i64: 1, 32>}, {pipeline_mode = #tpu.pipeline_mode<synchronous>, transform_indices = @transform_6, window_bounds = array<i64: 1, 32>}, {pipeline_mode = #tpu.pipeline_mode<synchronous>, transform_indices = @transform_7, window_bounds = array<i64: 32, 1024>}, {pipeline_mode = #tpu.pipeline_mode<synchronous>, transform_indices = @transform_8, window_bounds = array<i64: 1, 1024>}, {pipeline_mode = #tpu.pipeline_mode<synchronous>, transform_indices = @transform_9, window_bounds = array<i64: 1024, 32>}, {pipeline_mode = #tpu.pipeline_mode<synchronous>, transform_indices = @transform_10, window_bounds = array<i64: 1, 32>}, {pipeline_mode = #tpu.pipeline_mode<synchronous>, transform_indices = @transform_11, window_bounds = array<i64: 1, 32>}, {pipeline_mode = #tpu.pipeline_mode<synchronous>, transform_indices = @transform_12, window_bounds = array<i64: 1, 32>}, {pipeline_mode = #tpu.pipeline_mode<synchronous>, transform_indices = @transform_13, window_bounds = array<i64: 32, 128>}, {pipeline_mode = #tpu.pipeline_mode<synchronous>, transform_indices = @transform_14, window_bounds = array<i64: 1, 128>}, {transform_indices = @transform_15, window_bounds = array<i64: 1, 8, 128>}]} {
    %c0 = arith.constant 0 : index
    %c0_0 = arith.constant 0 : index
    %c0_1 = arith.constant 0 : index
    %0 = vector.load %arg1[%c0, %c0_0, %c0_1] : memref<1x8x32xf32, #tpu.memory_space<vmem>>, vector<1x8x32xf32>
    %1 = vector.shape_cast %0 : vector<1x8x32xf32> to vector<8x32xf32>
    %2 = arith.truncf %1 : vector<8x32xf32> to vector<8x32xbf16>
    %c0_2 = arith.constant 0 : index
    %c0_3 = arith.constant 0 : index
    %3 = vector.load %arg2[%c0_2, %c0_3] : memref<32x96xbf16, #tpu.memory_space<vmem>>, vector<32x96xbf16>
    %cst = arith.constant dense<0.000000e+00> : vector<8x96xf32>
    %4 = tpu.matmul %2, %3, %cst {dimension_numbers = #tpu.dot_dimension_numbers<[1], [0], [0], [1], [0, 0, 1, 1], [], []>} : vector<8x32xbf16>, vector<32x96xbf16>, vector<8x96xf32> -> vector<8x96xf32>
    %c0_4 = arith.constant 0 : index
    %c0_5 = arith.constant 0 : index
    %5 = vector.load %arg3[%c0_4, %c0_5] : memref<1x96xf32, #tpu.memory_space<vmem>>, vector<1x96xf32>
    %6 = vector.broadcast %5 : vector<1x96xf32> to vector<8x96xf32>
    %7 = arith.addf %4, %6 : vector<8x96xf32>
    %8 = vector.extract_strided_slice %7 {offsets = [0, 0], sizes = [8, 32], strides = [1, 1]} : vector<8x96xf32> to vector<8x32xf32>
    %cst_6 = arith.constant 5.000000e-01 : f32
    %9 = vector.broadcast %cst_6 : f32 to vector<8x32xf32>
    %10 = arith.mulf %8, %9 : vector<8x32xf32>
    %11 = vector.shape_cast %10 : vector<8x32xf32> to vector<1x8x32xf32>
    %12 = arith.truncf %11 : vector<1x8x32xf32> to vector<1x8x32xbf16>
    %13 = vector.extract_strided_slice %7 {offsets = [0, 32], sizes = [8, 32], strides = [1, 1]} : vector<8x96xf32> to vector<8x32xf32>
    %14 = vector.shape_cast %13 : vector<8x32xf32> to vector<1x8x32xf32>
    %15 = arith.truncf %14 : vector<1x8x32xf32> to vector<1x8x32xbf16>
    %16 = vector.extract_strided_slice %7 {offsets = [0, 64], sizes = [8, 32], strides = [1, 1]} : vector<8x96xf32> to vector<8x32xf32>
    %17 = vector.shape_cast %16 : vector<8x32xf32> to vector<1x8x32xf32>
    %18 = arith.truncf %17 : vector<1x8x32xf32> to vector<1x8x32xbf16>
    %19 = tpu.iota {dimensions = array<i32: 0>} : vector<8x8xi32>
    %20 = tpu.iota {dimensions = array<i32: 1>} : vector<8x8xi32>
    %21 = arith.cmpi sle, %20, %19 : vector<8x8xi32>
    %22 = vector.shape_cast %21 : vector<8x8xi1> to vector<1x8x8xi1>
    %23 = vector.extract_strided_slice %12 {offsets = [0, 0, 0], sizes = [1, 8, 4], strides = [1, 1, 1]} : vector<1x8x32xbf16> to vector<1x8x4xbf16>
    %24 = vector.extract_strided_slice %15 {offsets = [0, 0, 0], sizes = [1, 8, 4], strides = [1, 1, 1]} : vector<1x8x32xbf16> to vector<1x8x4xbf16>
    %25 = vector.extract_strided_slice %18 {offsets = [0, 0, 0], sizes = [1, 8, 4], strides = [1, 1, 1]} : vector<1x8x32xbf16> to vector<1x8x4xbf16>
    %cst_7 = arith.constant dense<0.000000e+00> : vector<1x8x8xf32>
    %26 = tpu.matmul %23, %24, %cst_7 {dimension_numbers = #tpu.dot_dimension_numbers<[2], [2], [1], [1], [0, 0, 0, 1, 1, 1], [0], [0]>} : vector<1x8x4xbf16>, vector<1x8x4xbf16>, vector<1x8x8xf32> -> vector<1x8x8xf32>
    %cst_8 = arith.constant -1.000000e+30 : f32
    %27 = vector.broadcast %cst_8 : f32 to vector<1x8x8xf32>
    %28 = arith.select %22, %26, %27 : vector<1x8x8xi1>, vector<1x8x8xf32>
    %cst_9 = arith.constant dense<0xFF800000> : vector<1x8xf32>
    %29 = vector.multi_reduction <maximumf>, %28, %cst_9 [2] : vector<1x8x8xf32> to vector<1x8xf32>
    %30 = vector.shape_cast %29 : vector<1x8xf32> to vector<1x8x1xf32>
    %31 = vector.broadcast %30 : vector<1x8x1xf32> to vector<1x8x8xf32>
    %32 = arith.subf %28, %31 : vector<1x8x8xf32>
    %33 = math.exp %32 : vector<1x8x8xf32>
    %cst_10 = arith.constant dense<0.000000e+00> : vector<1x8xf32>
    %34 = vector.multi_reduction <add>, %33, %cst_10 [2] : vector<1x8x8xf32> to vector<1x8xf32>
    %35 = vector.shape_cast %34 : vector<1x8xf32> to vector<1x8x1xf32>
    %36 = tpu.reciprocal %35 {approx = true} : vector<1x8x1xf32> -> vector<1x8x1xf32>
    %37 = vector.broadcast %36 : vector<1x8x1xf32> to vector<1x8x8xf32>
    %38 = arith.mulf %33, %37 : vector<1x8x8xf32>
    %39 = arith.truncf %38 : vector<1x8x8xf32> to vector<1x8x8xbf16>
    %cst_11 = arith.constant dense<0.000000e+00> : vector<1x8x4xf32>
    %40 = tpu.matmul %39, %25, %cst_11 {dimension_numbers = #tpu.dot_dimension_numbers<[2], [1], [1], [2], [0, 0, 0, 1, 1, 2], [0], [0]>} : vector<1x8x8xbf16>, vector<1x8x4xbf16>, vector<1x8x4xf32> -> vector<1x8x4xf32>
    %41 = vector.extract_strided_slice %12 {offsets = [0, 0, 4], sizes = [1, 8, 4], strides = [1, 1, 1]} : vector<1x8x32xbf16> to vector<1x8x4xbf16>
    %42 = vector.extract_strided_slice %15 {offsets = [0, 0, 4], sizes = [1, 8, 4], strides = [1, 1, 1]} : vector<1x8x32xbf16> to vector<1x8x4xbf16>
    %43 = vector.extract_strided_slice %18 {offsets = [0, 0, 4], sizes = [1, 8, 4], strides = [1, 1, 1]} : vector<1x8x32xbf16> to vector<1x8x4xbf16>
    %cst_12 = arith.constant dense<0.000000e+00> : vector<1x8x8xf32>
    %44 = tpu.matmul %41, %42, %cst_12 {dimension_numbers = #tpu.dot_dimension_numbers<[2], [2], [1], [1], [0, 0, 0, 1, 1, 1], [0], [0]>} : vector<1x8x4xbf16>, vector<1x8x4xbf16>, vector<1x8x8xf32> -> vector<1x8x8xf32>
    %cst_13 = arith.constant -1.000000e+30 : f32
    %45 = vector.broadcast %cst_13 : f32 to vector<1x8x8xf32>
    %46 = arith.select %22, %44, %45 : vector<1x8x8xi1>, vector<1x8x8xf32>
    %cst_14 = arith.constant dense<0xFF800000> : vector<1x8xf32>
    %47 = vector.multi_reduction <maximumf>, %46, %cst_14 [2] : vector<1x8x8xf32> to vector<1x8xf32>
    %48 = vector.shape_cast %47 : vector<1x8xf32> to vector<1x8x1xf32>
    %49 = vector.broadcast %48 : vector<1x8x1xf32> to vector<1x8x8xf32>
    %50 = arith.subf %46, %49 : vector<1x8x8xf32>
    %51 = math.exp %50 : vector<1x8x8xf32>
    %cst_15 = arith.constant dense<0.000000e+00> : vector<1x8xf32>
    %52 = vector.multi_reduction <add>, %51, %cst_15 [2] : vector<1x8x8xf32> to vector<1x8xf32>
    %53 = vector.shape_cast %52 : vector<1x8xf32> to vector<1x8x1xf32>
    %54 = tpu.reciprocal %53 {approx = true} : vector<1x8x1xf32> -> vector<1x8x1xf32>
    %55 = vector.broadcast %54 : vector<1x8x1xf32> to vector<1x8x8xf32>
    %56 = arith.mulf %51, %55 : vector<1x8x8xf32>
    %57 = arith.truncf %56 : vector<1x8x8xf32> to vector<1x8x8xbf16>
    %cst_16 = arith.constant dense<0.000000e+00> : vector<1x8x4xf32>
    %58 = tpu.matmul %57, %43, %cst_16 {dimension_numbers = #tpu.dot_dimension_numbers<[2], [1], [1], [2], [0, 0, 0, 1, 1, 2], [0], [0]>} : vector<1x8x8xbf16>, vector<1x8x4xbf16>, vector<1x8x4xf32> -> vector<1x8x4xf32>
    %59 = vector.extract_strided_slice %12 {offsets = [0, 0, 8], sizes = [1, 8, 4], strides = [1, 1, 1]} : vector<1x8x32xbf16> to vector<1x8x4xbf16>
    %60 = vector.extract_strided_slice %15 {offsets = [0, 0, 8], sizes = [1, 8, 4], strides = [1, 1, 1]} : vector<1x8x32xbf16> to vector<1x8x4xbf16>
    %61 = vector.extract_strided_slice %18 {offsets = [0, 0, 8], sizes = [1, 8, 4], strides = [1, 1, 1]} : vector<1x8x32xbf16> to vector<1x8x4xbf16>
    %cst_17 = arith.constant dense<0.000000e+00> : vector<1x8x8xf32>
    %62 = tpu.matmul %59, %60, %cst_17 {dimension_numbers = #tpu.dot_dimension_numbers<[2], [2], [1], [1], [0, 0, 0, 1, 1, 1], [0], [0]>} : vector<1x8x4xbf16>, vector<1x8x4xbf16>, vector<1x8x8xf32> -> vector<1x8x8xf32>
    %cst_18 = arith.constant -1.000000e+30 : f32
    %63 = vector.broadcast %cst_18 : f32 to vector<1x8x8xf32>
    %64 = arith.select %22, %62, %63 : vector<1x8x8xi1>, vector<1x8x8xf32>
    %cst_19 = arith.constant dense<0xFF800000> : vector<1x8xf32>
    %65 = vector.multi_reduction <maximumf>, %64, %cst_19 [2] : vector<1x8x8xf32> to vector<1x8xf32>
    %66 = vector.shape_cast %65 : vector<1x8xf32> to vector<1x8x1xf32>
    %67 = vector.broadcast %66 : vector<1x8x1xf32> to vector<1x8x8xf32>
    %68 = arith.subf %64, %67 : vector<1x8x8xf32>
    %69 = math.exp %68 : vector<1x8x8xf32>
    %cst_20 = arith.constant dense<0.000000e+00> : vector<1x8xf32>
    %70 = vector.multi_reduction <add>, %69, %cst_20 [2] : vector<1x8x8xf32> to vector<1x8xf32>
    %71 = vector.shape_cast %70 : vector<1x8xf32> to vector<1x8x1xf32>
    %72 = tpu.reciprocal %71 {approx = true} : vector<1x8x1xf32> -> vector<1x8x1xf32>
    %73 = vector.broadcast %72 : vector<1x8x1xf32> to vector<1x8x8xf32>
    %74 = arith.mulf %69, %73 : vector<1x8x8xf32>
    %75 = arith.truncf %74 : vector<1x8x8xf32> to vector<1x8x8xbf16>
    %cst_21 = arith.constant dense<0.000000e+00> : vector<1x8x4xf32>
    %76 = tpu.matmul %75, %61, %cst_21 {dimension_numbers = #tpu.dot_dimension_numbers<[2], [1], [1], [2], [0, 0, 0, 1, 1, 2], [0], [0]>} : vector<1x8x8xbf16>, vector<1x8x4xbf16>, vector<1x8x4xf32> -> vector<1x8x4xf32>
    %77 = vector.extract_strided_slice %12 {offsets = [0, 0, 12], sizes = [1, 8, 4], strides = [1, 1, 1]} : vector<1x8x32xbf16> to vector<1x8x4xbf16>
    %78 = vector.extract_strided_slice %15 {offsets = [0, 0, 12], sizes = [1, 8, 4], strides = [1, 1, 1]} : vector<1x8x32xbf16> to vector<1x8x4xbf16>
    %79 = vector.extract_strided_slice %18 {offsets = [0, 0, 12], sizes = [1, 8, 4], strides = [1, 1, 1]} : vector<1x8x32xbf16> to vector<1x8x4xbf16>
    %cst_22 = arith.constant dense<0.000000e+00> : vector<1x8x8xf32>
    %80 = tpu.matmul %77, %78, %cst_22 {dimension_numbers = #tpu.dot_dimension_numbers<[2], [2], [1], [1], [0, 0, 0, 1, 1, 1], [0], [0]>} : vector<1x8x4xbf16>, vector<1x8x4xbf16>, vector<1x8x8xf32> -> vector<1x8x8xf32>
    %cst_23 = arith.constant -1.000000e+30 : f32
    %81 = vector.broadcast %cst_23 : f32 to vector<1x8x8xf32>
    %82 = arith.select %22, %80, %81 : vector<1x8x8xi1>, vector<1x8x8xf32>
    %cst_24 = arith.constant dense<0xFF800000> : vector<1x8xf32>
    %83 = vector.multi_reduction <maximumf>, %82, %cst_24 [2] : vector<1x8x8xf32> to vector<1x8xf32>
    %84 = vector.shape_cast %83 : vector<1x8xf32> to vector<1x8x1xf32>
    %85 = vector.broadcast %84 : vector<1x8x1xf32> to vector<1x8x8xf32>
    %86 = arith.subf %82, %85 : vector<1x8x8xf32>
    %87 = math.exp %86 : vector<1x8x8xf32>
    %cst_25 = arith.constant dense<0.000000e+00> : vector<1x8xf32>
    %88 = vector.multi_reduction <add>, %87, %cst_25 [2] : vector<1x8x8xf32> to vector<1x8xf32>
    %89 = vector.shape_cast %88 : vector<1x8xf32> to vector<1x8x1xf32>
    %90 = tpu.reciprocal %89 {approx = true} : vector<1x8x1xf32> -> vector<1x8x1xf32>
    %91 = vector.broadcast %90 : vector<1x8x1xf32> to vector<1x8x8xf32>
    %92 = arith.mulf %87, %91 : vector<1x8x8xf32>
    %93 = arith.truncf %92 : vector<1x8x8xf32> to vector<1x8x8xbf16>
    %cst_26 = arith.constant dense<0.000000e+00> : vector<1x8x4xf32>
    %94 = tpu.matmul %93, %79, %cst_26 {dimension_numbers = #tpu.dot_dimension_numbers<[2], [1], [1], [2], [0, 0, 0, 1, 1, 2], [0], [0]>} : vector<1x8x8xbf16>, vector<1x8x4xbf16>, vector<1x8x4xf32> -> vector<1x8x4xf32>
    %95 = vector.extract_strided_slice %12 {offsets = [0, 0, 16], sizes = [1, 8, 4], strides = [1, 1, 1]} : vector<1x8x32xbf16> to vector<1x8x4xbf16>
    %96 = vector.extract_strided_slice %15 {offsets = [0, 0, 16], sizes = [1, 8, 4], strides = [1, 1, 1]} : vector<1x8x32xbf16> to vector<1x8x4xbf16>
    %97 = vector.extract_strided_slice %18 {offsets = [0, 0, 16], sizes = [1, 8, 4], strides = [1, 1, 1]} : vector<1x8x32xbf16> to vector<1x8x4xbf16>
    %cst_27 = arith.constant dense<0.000000e+00> : vector<1x8x8xf32>
    %98 = tpu.matmul %95, %96, %cst_27 {dimension_numbers = #tpu.dot_dimension_numbers<[2], [2], [1], [1], [0, 0, 0, 1, 1, 1], [0], [0]>} : vector<1x8x4xbf16>, vector<1x8x4xbf16>, vector<1x8x8xf32> -> vector<1x8x8xf32>
    %cst_28 = arith.constant -1.000000e+30 : f32
    %99 = vector.broadcast %cst_28 : f32 to vector<1x8x8xf32>
    %100 = arith.select %22, %98, %99 : vector<1x8x8xi1>, vector<1x8x8xf32>
    %cst_29 = arith.constant dense<0xFF800000> : vector<1x8xf32>
    %101 = vector.multi_reduction <maximumf>, %100, %cst_29 [2] : vector<1x8x8xf32> to vector<1x8xf32>
    %102 = vector.shape_cast %101 : vector<1x8xf32> to vector<1x8x1xf32>
    %103 = vector.broadcast %102 : vector<1x8x1xf32> to vector<1x8x8xf32>
    %104 = arith.subf %100, %103 : vector<1x8x8xf32>
    %105 = math.exp %104 : vector<1x8x8xf32>
    %cst_30 = arith.constant dense<0.000000e+00> : vector<1x8xf32>
    %106 = vector.multi_reduction <add>, %105, %cst_30 [2] : vector<1x8x8xf32> to vector<1x8xf32>
    %107 = vector.shape_cast %106 : vector<1x8xf32> to vector<1x8x1xf32>
    %108 = tpu.reciprocal %107 {approx = true} : vector<1x8x1xf32> -> vector<1x8x1xf32>
    %109 = vector.broadcast %108 : vector<1x8x1xf32> to vector<1x8x8xf32>
    %110 = arith.mulf %105, %109 : vector<1x8x8xf32>
    %111 = arith.truncf %110 : vector<1x8x8xf32> to vector<1x8x8xbf16>
    %cst_31 = arith.constant dense<0.000000e+00> : vector<1x8x4xf32>
    %112 = tpu.matmul %111, %97, %cst_31 {dimension_numbers = #tpu.dot_dimension_numbers<[2], [1], [1], [2], [0, 0, 0, 1, 1, 2], [0], [0]>} : vector<1x8x8xbf16>, vector<1x8x4xbf16>, vector<1x8x4xf32> -> vector<1x8x4xf32>
    %113 = vector.extract_strided_slice %12 {offsets = [0, 0, 20], sizes = [1, 8, 4], strides = [1, 1, 1]} : vector<1x8x32xbf16> to vector<1x8x4xbf16>
    %114 = vector.extract_strided_slice %15 {offsets = [0, 0, 20], sizes = [1, 8, 4], strides = [1, 1, 1]} : vector<1x8x32xbf16> to vector<1x8x4xbf16>
    %115 = vector.extract_strided_slice %18 {offsets = [0, 0, 20], sizes = [1, 8, 4], strides = [1, 1, 1]} : vector<1x8x32xbf16> to vector<1x8x4xbf16>
    %cst_32 = arith.constant dense<0.000000e+00> : vector<1x8x8xf32>
    %116 = tpu.matmul %113, %114, %cst_32 {dimension_numbers = #tpu.dot_dimension_numbers<[2], [2], [1], [1], [0, 0, 0, 1, 1, 1], [0], [0]>} : vector<1x8x4xbf16>, vector<1x8x4xbf16>, vector<1x8x8xf32> -> vector<1x8x8xf32>
    %cst_33 = arith.constant -1.000000e+30 : f32
    %117 = vector.broadcast %cst_33 : f32 to vector<1x8x8xf32>
    %118 = arith.select %22, %116, %117 : vector<1x8x8xi1>, vector<1x8x8xf32>
    %cst_34 = arith.constant dense<0xFF800000> : vector<1x8xf32>
    %119 = vector.multi_reduction <maximumf>, %118, %cst_34 [2] : vector<1x8x8xf32> to vector<1x8xf32>
    %120 = vector.shape_cast %119 : vector<1x8xf32> to vector<1x8x1xf32>
    %121 = vector.broadcast %120 : vector<1x8x1xf32> to vector<1x8x8xf32>
    %122 = arith.subf %118, %121 : vector<1x8x8xf32>
    %123 = math.exp %122 : vector<1x8x8xf32>
    %cst_35 = arith.constant dense<0.000000e+00> : vector<1x8xf32>
    %124 = vector.multi_reduction <add>, %123, %cst_35 [2] : vector<1x8x8xf32> to vector<1x8xf32>
    %125 = vector.shape_cast %124 : vector<1x8xf32> to vector<1x8x1xf32>
    %126 = tpu.reciprocal %125 {approx = true} : vector<1x8x1xf32> -> vector<1x8x1xf32>
    %127 = vector.broadcast %126 : vector<1x8x1xf32> to vector<1x8x8xf32>
    %128 = arith.mulf %123, %127 : vector<1x8x8xf32>
    %129 = arith.truncf %128 : vector<1x8x8xf32> to vector<1x8x8xbf16>
    %cst_36 = arith.constant dense<0.000000e+00> : vector<1x8x4xf32>
    %130 = tpu.matmul %129, %115, %cst_36 {dimension_numbers = #tpu.dot_dimension_numbers<[2], [1], [1], [2], [0, 0, 0, 1, 1, 2], [0], [0]>} : vector<1x8x8xbf16>, vector<1x8x4xbf16>, vector<1x8x4xf32> -> vector<1x8x4xf32>
    %131 = vector.extract_strided_slice %12 {offsets = [0, 0, 24], sizes = [1, 8, 4], strides = [1, 1, 1]} : vector<1x8x32xbf16> to vector<1x8x4xbf16>
    %132 = vector.extract_strided_slice %15 {offsets = [0, 0, 24], sizes = [1, 8, 4], strides = [1, 1, 1]} : vector<1x8x32xbf16> to vector<1x8x4xbf16>
    %133 = vector.extract_strided_slice %18 {offsets = [0, 0, 24], sizes = [1, 8, 4], strides = [1, 1, 1]} : vector<1x8x32xbf16> to vector<1x8x4xbf16>
    %cst_37 = arith.constant dense<0.000000e+00> : vector<1x8x8xf32>
    %134 = tpu.matmul %131, %132, %cst_37 {dimension_numbers = #tpu.dot_dimension_numbers<[2], [2], [1], [1], [0, 0, 0, 1, 1, 1], [0], [0]>} : vector<1x8x4xbf16>, vector<1x8x4xbf16>, vector<1x8x8xf32> -> vector<1x8x8xf32>
    %cst_38 = arith.constant -1.000000e+30 : f32
    %135 = vector.broadcast %cst_38 : f32 to vector<1x8x8xf32>
    %136 = arith.select %22, %134, %135 : vector<1x8x8xi1>, vector<1x8x8xf32>
    %cst_39 = arith.constant dense<0xFF800000> : vector<1x8xf32>
    %137 = vector.multi_reduction <maximumf>, %136, %cst_39 [2] : vector<1x8x8xf32> to vector<1x8xf32>
    %138 = vector.shape_cast %137 : vector<1x8xf32> to vector<1x8x1xf32>
    %139 = vector.broadcast %138 : vector<1x8x1xf32> to vector<1x8x8xf32>
    %140 = arith.subf %136, %139 : vector<1x8x8xf32>
    %141 = math.exp %140 : vector<1x8x8xf32>
    %cst_40 = arith.constant dense<0.000000e+00> : vector<1x8xf32>
    %142 = vector.multi_reduction <add>, %141, %cst_40 [2] : vector<1x8x8xf32> to vector<1x8xf32>
    %143 = vector.shape_cast %142 : vector<1x8xf32> to vector<1x8x1xf32>
    %144 = tpu.reciprocal %143 {approx = true} : vector<1x8x1xf32> -> vector<1x8x1xf32>
    %145 = vector.broadcast %144 : vector<1x8x1xf32> to vector<1x8x8xf32>
    %146 = arith.mulf %141, %145 : vector<1x8x8xf32>
    %147 = arith.truncf %146 : vector<1x8x8xf32> to vector<1x8x8xbf16>
    %cst_41 = arith.constant dense<0.000000e+00> : vector<1x8x4xf32>
    %148 = tpu.matmul %147, %133, %cst_41 {dimension_numbers = #tpu.dot_dimension_numbers<[2], [1], [1], [2], [0, 0, 0, 1, 1, 2], [0], [0]>} : vector<1x8x8xbf16>, vector<1x8x4xbf16>, vector<1x8x4xf32> -> vector<1x8x4xf32>
    %149 = vector.extract_strided_slice %12 {offsets = [0, 0, 28], sizes = [1, 8, 4], strides = [1, 1, 1]} : vector<1x8x32xbf16> to vector<1x8x4xbf16>
    %150 = vector.extract_strided_slice %15 {offsets = [0, 0, 28], sizes = [1, 8, 4], strides = [1, 1, 1]} : vector<1x8x32xbf16> to vector<1x8x4xbf16>
    %151 = vector.extract_strided_slice %18 {offsets = [0, 0, 28], sizes = [1, 8, 4], strides = [1, 1, 1]} : vector<1x8x32xbf16> to vector<1x8x4xbf16>
    %cst_42 = arith.constant dense<0.000000e+00> : vector<1x8x8xf32>
    %152 = tpu.matmul %149, %150, %cst_42 {dimension_numbers = #tpu.dot_dimension_numbers<[2], [2], [1], [1], [0, 0, 0, 1, 1, 1], [0], [0]>} : vector<1x8x4xbf16>, vector<1x8x4xbf16>, vector<1x8x8xf32> -> vector<1x8x8xf32>
    %cst_43 = arith.constant -1.000000e+30 : f32
    %153 = vector.broadcast %cst_43 : f32 to vector<1x8x8xf32>
    %154 = arith.select %22, %152, %153 : vector<1x8x8xi1>, vector<1x8x8xf32>
    %cst_44 = arith.constant dense<0xFF800000> : vector<1x8xf32>
    %155 = vector.multi_reduction <maximumf>, %154, %cst_44 [2] : vector<1x8x8xf32> to vector<1x8xf32>
    %156 = vector.shape_cast %155 : vector<1x8xf32> to vector<1x8x1xf32>
    %157 = vector.broadcast %156 : vector<1x8x1xf32> to vector<1x8x8xf32>
    %158 = arith.subf %154, %157 : vector<1x8x8xf32>
    %159 = math.exp %158 : vector<1x8x8xf32>
    %cst_45 = arith.constant dense<0.000000e+00> : vector<1x8xf32>
    %160 = vector.multi_reduction <add>, %159, %cst_45 [2] : vector<1x8x8xf32> to vector<1x8xf32>
    %161 = vector.shape_cast %160 : vector<1x8xf32> to vector<1x8x1xf32>
    %162 = tpu.reciprocal %161 {approx = true} : vector<1x8x1xf32> -> vector<1x8x1xf32>
    %163 = vector.broadcast %162 : vector<1x8x1xf32> to vector<1x8x8xf32>
    %164 = arith.mulf %159, %163 : vector<1x8x8xf32>
    %165 = arith.truncf %164 : vector<1x8x8xf32> to vector<1x8x8xbf16>
    %cst_46 = arith.constant dense<0.000000e+00> : vector<1x8x4xf32>
    %166 = tpu.matmul %165, %151, %cst_46 {dimension_numbers = #tpu.dot_dimension_numbers<[2], [1], [1], [2], [0, 0, 0, 1, 1, 2], [0], [0]>} : vector<1x8x8xbf16>, vector<1x8x4xbf16>, vector<1x8x4xf32> -> vector<1x8x4xf32>
    %167 = tpu.concatenate %40, %58, %76, %94, %112, %130, %148, %166 in 2 : vector<1x8x4xf32>, vector<1x8x4xf32>, vector<1x8x4xf32>, vector<1x8x4xf32>, vector<1x8x4xf32>, vector<1x8x4xf32>, vector<1x8x4xf32>, vector<1x8x4xf32> -> vector<1x8x32xf32>
    %168 = vector.shape_cast %167 : vector<1x8x32xf32> to vector<8x32xf32>
    %169 = arith.truncf %168 : vector<8x32xf32> to vector<8x32xbf16>
    %c0_47 = arith.constant 0 : index
    %c0_48 = arith.constant 0 : index
    %170 = vector.load %arg4[%c0_47, %c0_48] : memref<32x32xbf16, #tpu.memory_space<vmem>>, vector<32x32xbf16>
    %cst_49 = arith.constant dense<0.000000e+00> : vector<8x32xf32>
    %171 = tpu.matmul %169, %170, %cst_49 {dimension_numbers = #tpu.dot_dimension_numbers<[1], [0], [0], [1], [0, 0, 1, 1], [], []>} : vector<8x32xbf16>, vector<32x32xbf16>, vector<8x32xf32> -> vector<8x32xf32>
    %c0_50 = arith.constant 0 : index
    %c0_51 = arith.constant 0 : index
    %172 = vector.load %arg5[%c0_50, %c0_51] : memref<1x32xf32, #tpu.memory_space<vmem>>, vector<1x32xf32>
    %173 = vector.broadcast %172 : vector<1x32xf32> to vector<8x32xf32>
    %174 = arith.addf %171, %173 : vector<8x32xf32>
    %175 = arith.addf %1, %174 : vector<8x32xf32>
    %c0_52 = arith.constant 0 : index
    %c0_53 = arith.constant 0 : index
    %176 = vector.load %arg6[%c0_52, %c0_53] : memref<1x32xf32, #tpu.memory_space<vmem>>, vector<1x32xf32>
    %c0_54 = arith.constant 0 : index
    %c0_55 = arith.constant 0 : index
    %177 = vector.load %arg7[%c0_54, %c0_55] : memref<1x32xf32, #tpu.memory_space<vmem>>, vector<1x32xf32>
    %cst_56 = arith.constant dense<0.000000e+00> : vector<8xf32>
    %178 = vector.multi_reduction <add>, %175, %cst_56 [1] : vector<8x32xf32> to vector<8xf32>
    %179 = vector.shape_cast %178 : vector<8xf32> to vector<8x1xf32>
    %cst_57 = arith.constant 3.200000e+01 : f32
    %180 = vector.broadcast %cst_57 : f32 to vector<8x1xf32>
    %181 = arith.divf %179, %180 : vector<8x1xf32>
    %182 = vector.broadcast %181 : vector<8x1xf32> to vector<8x32xf32>
    %183 = arith.subf %175, %182 : vector<8x32xf32>
    %184 = arith.mulf %183, %183 : vector<8x32xf32>
    %cst_58 = arith.constant dense<0.000000e+00> : vector<8xf32>
    %185 = vector.multi_reduction <add>, %184, %cst_58 [1] : vector<8x32xf32> to vector<8xf32>
    %186 = vector.shape_cast %185 : vector<8xf32> to vector<8x1xf32>
    %cst_59 = arith.constant 3.200000e+01 : f32
    %187 = vector.broadcast %cst_59 : f32 to vector<8x1xf32>
    %188 = arith.divf %186, %187 : vector<8x1xf32>
    %cst_60 = arith.constant 9.99999974E-6 : f32
    %189 = vector.broadcast %cst_60 : f32 to vector<8x1xf32>
    %190 = arith.addf %188, %189 : vector<8x1xf32>
    %191 = math.rsqrt %190 : vector<8x1xf32>
    %192 = vector.broadcast %191 : vector<8x1xf32> to vector<8x32xf32>
    %193 = arith.mulf %183, %192 : vector<8x32xf32>
    %194 = vector.broadcast %176 : vector<1x32xf32> to vector<8x32xf32>
    %195 = arith.mulf %193, %194 : vector<8x32xf32>
    %196 = vector.broadcast %177 : vector<1x32xf32> to vector<8x32xf32>
    %197 = arith.addf %195, %196 : vector<8x32xf32>
    %198 = arith.truncf %197 : vector<8x32xf32> to vector<8x32xbf16>
    %c0_61 = arith.constant 0 : index
    %c0_62 = arith.constant 0 : index
    %199 = vector.load %arg8[%c0_61, %c0_62] : memref<32x1024xbf16, #tpu.memory_space<vmem>>, vector<32x1024xbf16>
    %cst_63 = arith.constant dense<0.000000e+00> : vector<8x1024xf32>
    %200 = tpu.matmul %198, %199, %cst_63 {dimension_numbers = #tpu.dot_dimension_numbers<[1], [0], [0], [1], [0, 0, 1, 1], [], []>} : vector<8x32xbf16>, vector<32x1024xbf16>, vector<8x1024xf32> -> vector<8x1024xf32>
    %c0_64 = arith.constant 0 : index
    %c0_65 = arith.constant 0 : index
    %201 = vector.load %arg9[%c0_64, %c0_65] : memref<1x1024xf32, #tpu.memory_space<vmem>>, vector<1x1024xf32>
    %202 = vector.broadcast %201 : vector<1x1024xf32> to vector<8x1024xf32>
    %203 = arith.addf %200, %202 : vector<8x1024xf32>
    %cst_66 = arith.constant 0.000000e+00 : f32
    %204 = vector.broadcast %cst_66 : f32 to vector<8x1024xf32>
    %205 = arith.maximumf %203, %204 : vector<8x1024xf32>
    %206 = arith.truncf %205 : vector<8x1024xf32> to vector<8x1024xbf16>
    %c0_67 = arith.constant 0 : index
    %c0_68 = arith.constant 0 : index
    %207 = vector.load %arg10[%c0_67, %c0_68] : memref<1024x32xbf16, #tpu.memory_space<vmem>>, vector<1024x32xbf16>
    %cst_69 = arith.constant dense<0.000000e+00> : vector<8x32xf32>
    %208 = tpu.matmul %206, %207, %cst_69 {dimension_numbers = #tpu.dot_dimension_numbers<[1], [0], [0], [1], [0, 0, 1, 1], [], []>} : vector<8x1024xbf16>, vector<1024x32xbf16>, vector<8x32xf32> -> vector<8x32xf32>
    %c0_70 = arith.constant 0 : index
    %c0_71 = arith.constant 0 : index
    %209 = vector.load %arg11[%c0_70, %c0_71] : memref<1x32xf32, #tpu.memory_space<vmem>>, vector<1x32xf32>
    %210 = vector.broadcast %209 : vector<1x32xf32> to vector<8x32xf32>
    %211 = arith.addf %208, %210 : vector<8x32xf32>
    %212 = arith.addf %197, %211 : vector<8x32xf32>
    %c0_72 = arith.constant 0 : index
    %c0_73 = arith.constant 0 : index
    %213 = vector.load %arg12[%c0_72, %c0_73] : memref<1x32xf32, #tpu.memory_space<vmem>>, vector<1x32xf32>
    %c0_74 = arith.constant 0 : index
    %c0_75 = arith.constant 0 : index
    %214 = vector.load %arg13[%c0_74, %c0_75] : memref<1x32xf32, #tpu.memory_space<vmem>>, vector<1x32xf32>
    %cst_76 = arith.constant dense<0.000000e+00> : vector<8xf32>
    %215 = vector.multi_reduction <add>, %212, %cst_76 [1] : vector<8x32xf32> to vector<8xf32>
    %216 = vector.shape_cast %215 : vector<8xf32> to vector<8x1xf32>
    %cst_77 = arith.constant 3.200000e+01 : f32
    %217 = vector.broadcast %cst_77 : f32 to vector<8x1xf32>
    %218 = arith.divf %216, %217 : vector<8x1xf32>
    %219 = vector.broadcast %218 : vector<8x1xf32> to vector<8x32xf32>
    %220 = arith.subf %212, %219 : vector<8x32xf32>
    %221 = arith.mulf %220, %220 : vector<8x32xf32>
    %cst_78 = arith.constant dense<0.000000e+00> : vector<8xf32>
    %222 = vector.multi_reduction <add>, %221, %cst_78 [1] : vector<8x32xf32> to vector<8xf32>
    %223 = vector.shape_cast %222 : vector<8xf32> to vector<8x1xf32>
    %cst_79 = arith.constant 3.200000e+01 : f32
    %224 = vector.broadcast %cst_79 : f32 to vector<8x1xf32>
    %225 = arith.divf %223, %224 : vector<8x1xf32>
    %cst_80 = arith.constant 9.99999974E-6 : f32
    %226 = vector.broadcast %cst_80 : f32 to vector<8x1xf32>
    %227 = arith.addf %225, %226 : vector<8x1xf32>
    %228 = math.rsqrt %227 : vector<8x1xf32>
    %229 = vector.broadcast %228 : vector<8x1xf32> to vector<8x32xf32>
    %230 = arith.mulf %220, %229 : vector<8x32xf32>
    %231 = vector.broadcast %213 : vector<1x32xf32> to vector<8x32xf32>
    %232 = arith.mulf %230, %231 : vector<8x32xf32>
    %233 = vector.broadcast %214 : vector<1x32xf32> to vector<8x32xf32>
    %234 = arith.addf %232, %233 : vector<8x32xf32>
    %235 = arith.truncf %234 : vector<8x32xf32> to vector<8x32xbf16>
    %c0_81 = arith.constant 0 : index
    %c0_82 = arith.constant 0 : index
    %236 = vector.load %arg14[%c0_81, %c0_82] : memref<32x128xbf16, #tpu.memory_space<vmem>>, vector<32x128xbf16>
    %cst_83 = arith.constant dense<0.000000e+00> : vector<8x128xf32>
    %237 = tpu.matmul %235, %236, %cst_83 {dimension_numbers = #tpu.dot_dimension_numbers<[1], [0], [0], [1], [0, 0, 1, 1], [], []>} : vector<8x32xbf16>, vector<32x128xbf16>, vector<8x128xf32> -> vector<8x128xf32>
    %c0_84 = arith.constant 0 : index
    %c0_85 = arith.constant 0 : index
    %238 = vector.load %arg15[%c0_84, %c0_85] : memref<1x128xf32, #tpu.memory_space<vmem>>, vector<1x128xf32>
    %239 = vector.broadcast %238 : vector<1x128xf32> to vector<8x128xf32>
    %240 = arith.addf %237, %239 : vector<8x128xf32>
    %241 = vector.shape_cast %240 : vector<8x128xf32> to vector<1x8x128xf32>
    %c0_86 = arith.constant 0 : index
    %c0_87 = arith.constant 0 : index
    %c0_88 = arith.constant 0 : index
    %242 = vector.load %arg16[%c0_86, %c0_87, %c0_88] : memref<1x8x128xf32, #tpu.memory_space<vmem>>, vector<1x8x128xf32>
    tpu.vector_store %arg16[%c0_86, %c0_87, %c0_88], %241 {strides = array<i32>} : memref<1x8x128xf32, #tpu.memory_space<vmem>>, vector<1x8x128xf32>,
    return
  }
  func.func @transform_0(%arg0: i32) -> (i32, i32, i32) {
    %c0_i32 = arith.constant 0 : i32
    %c0_i32_0 = arith.constant 0 : i32
    %c0_i32_1 = arith.constant 0 : i32
    return %arg0, %c0_i32, %c0_i32_0 : i32, i32, i32
  }
  func.func @transform_1(%arg0: i32) -> (i32, i32) {
    %c0_i32 = arith.constant 0 : i32
    %c0_i32_0 = arith.constant 0 : i32
    %c0_i32_1 = arith.constant 0 : i32
    return %c0_i32, %c0_i32_0 : i32, i32
  }
  func.func @transform_2(%arg0: i32) -> (i32, i32) {
    %c0_i32 = arith.constant 0 : i32
    %c0_i32_0 = arith.constant 0 : i32
    %c0_i32_1 = arith.constant 0 : i32
    return %c0_i32, %c0_i32_0 : i32, i32
  }
  func.func @transform_3(%arg0: i32) -> (i32, i32) {
    %c0_i32 = arith.constant 0 : i32
    %c0_i32_0 = arith.constant 0 : i32
    %c0_i32_1 = arith.constant 0 : i32
    return %c0_i32, %c0_i32_0 : i32, i32
  }
  func.func @transform_4(%arg0: i32) -> (i32, i32) {
    %c0_i32 = arith.constant 0 : i32
    %c0_i32_0 = arith.constant 0 : i32
    %c0_i32_1 = arith.constant 0 : i32
    return %c0_i32, %c0_i32_0 : i32, i32
  }
  func.func @transform_5(%arg0: i32) -> (i32, i32) {
    %c0_i32 = arith.constant 0 : i32
    %c0_i32_0 = arith.constant 0 : i32
    %c0_i32_1 = arith.constant 0 : i32
    return %c0_i32, %c0_i32_0 : i32, i32
  }
  func.func @transform_6(%arg0: i32) -> (i32, i32) {
    %c0_i32 = arith.constant 0 : i32
    %c0_i32_0 = arith.constant 0 : i32
    %c0_i32_1 = arith.constant 0 : i32
    return %c0_i32, %c0_i32_0 : i32, i32
  }
  func.func @transform_7(%arg0: i32) -> (i32, i32) {
    %c0_i32 = arith.constant 0 : i32
    %c0_i32_0 = arith.constant 0 : i32
    %c0_i32_1 = arith.constant 0 : i32
    return %c0_i32, %c0_i32_0 : i32, i32
  }
  func.func @transform_8(%arg0: i32) -> (i32, i32) {
    %c0_i32 = arith.constant 0 : i32
    %c0_i32_0 = arith.constant 0 : i32
    %c0_i32_1 = arith.constant 0 : i32
    return %c0_i32, %c0_i32_0 : i32, i32
  }
  func.func @transform_9(%arg0: i32) -> (i32, i32) {
    %c0_i32 = arith.constant 0 : i32
    %c0_i32_0 = arith.constant 0 : i32
    %c0_i32_1 = arith.constant 0 : i32
    return %c0_i32, %c0_i32_0 : i32, i32
  }
  func.func @transform_10(%arg0: i32) -> (i32, i32) {
    %c0_i32 = arith.constant 0 : i32
    %c0_i32_0 = arith.constant 0 : i32
    %c0_i32_1 = arith.constant 0 : i32
    return %c0_i32, %c0_i32_0 : i32, i32
  }
  func.func @transform_11(%arg0: i32) -> (i32, i32) {
    %c0_i32 = arith.constant 0 : i32
    %c0_i32_0 = arith.constant 0 : i32
    %c0_i32_1 = arith.constant 0 : i32
    return %c0_i32, %c0_i32_0 : i32, i32
  }
  func.func @transform_12(%arg0: i32) -> (i32, i32) {
    %c0_i32 = arith.constant 0 : i32
    %c0_i32_0 = arith.constant 0 : i32
    %c0_i32_1 = arith.constant 0 : i32
    return %c0_i32, %c0_i32_0 : i32, i32
  }
  func.func @transform_13(%arg0: i32) -> (i32, i32) {
    %c0_i32 = arith.constant 0 : i32
    %c0_i32_0 = arith.constant 0 : i32
    %c0_i32_1 = arith.constant 0 : i32
    return %c0_i32, %c0_i32_0 : i32, i32
  }
  func.func @transform_14(%arg0: i32) -> (i32, i32) {
    %c0_i32 = arith.constant 0 : i32
    %c0_i32_0 = arith.constant 0 : i32
    %c0_i32_1 = arith.constant 0 : i32
    return %c0_i32, %c0_i32_0 : i32, i32
  }
  func.func @transform_15(%arg0: i32) -> (i32, i32, i32) {
    %c0_i32 = arith.constant 0 : i32
    %c0_i32_0 = arith.constant 0 : i32
    %c0_i32_1 = arith.constant 0 : i32
    return %arg0, %c0_i32, %c0_i32_0 : i32, i32, i32
  }
}

</mosaic_0001>

<bundles_post_ra>
// kernel: tpu_custom_call.1
= control target key start
LH: loop header
LB: loop body
LE: loop exit
PB: predicated region body
PF: predicated region fallthrough
CT: control target
= control target key end

     0   :  { %s4126_s0 = inlined_call_operand.vmem [shape: f32[2,8,32], index: 0, kind: input, shape index: {}]   ;;  %s4127_s1 = inlined_call_operand.vmem [shape: bf16[32,96], index: 1, kind: input, shape index: {}]   ;;  %s4128_s2 = inlined_call_operand.vmem [shape: f32[1,96], index: 2, kind: input, shape index: {}]   ;;  %s4129_s3 = inlined_call_operand.vmem [shape: bf16[32,32], index: 3, kind: input, shape index: {}]   ;;  %s4130_s4 = inlined_call_operand.vmem [shape: f32[1,32], index: 4, kind: input, shape index: {}]   ;;  %s4131_s5 = inlined_call_operand.vmem [shape: f32[1,32], index: 5, kind: input, shape index: {}]   ;;  %s4132_s6 = inlined_call_operand.vmem [shape: f32[1,32], index: 6, kind: input, shape index: {}]   ;;  %s4133_s7 = inlined_call_operand.vmem [shape: bf16[32,1024], index: 7, kind: input, shape index: {}]   ;;  %s4134_s8 = inlined_call_operand.vmem [shape: f32[1,1024], index: 8, kind: input, shape index: {}]   ;;  %s4135_s9 = inlined_call_operand.vmem [shape: bf16[1024,32], index: 9, kind: input, shape index: {}]   ;;  %s4136_s10 = inlined_call_operand.vmem [shape: f32[1,32], index: 10, kind: input, shape index: {}]   ;;  %s4137_s11 = inlined_call_operand.vmem [shape: f32[1,32], index: 11, kind: input, shape index: {}]   ;;  %s4138_s12 = inlined_call_operand.vmem [shape: f32[1,32], index: 12, kind: input, shape index: {}]   ;;  %s4139_s13 = inlined_call_operand.vmem [shape: bf16[32,128], index: 13, kind: input, shape index: {}]   ;;  %s4140_s14 = inlined_call_operand.vmem [shape: f32[1,128], index: 14, kind: input, shape index: {}]   ;;  %s4141_s15 = inlined_call_operand.hbm [shape: f32[2,8,128], index: 15, kind: output, shape index: {}]  }
   0x1   :  { %4142 = sst [smem:[#allocation6_spill]] %s4126_s0 }
   0x2   :  { %4143 = sst [smem:[#allocation7_spill]] %s4127_s1 }
   0x3   :  { %4144 = sst [smem:[#allocation8_spill]] %s4128_s2 }
   0x4   :  { %20 = vsyncpa [#allocation3], 0 }
   0x5   :  { %22 = vsyncpa [#allocation3 + $0x1], 0  ;;  %s3502_s18 = smov 0   ;;  %s3504_s19 = smov 0  }
   0x6   :  { %s3506_s20 = smov 0   ;;  %s3508_s21 = smov 0  }
   0x7 LB: > { %s3523_s22 = sadd.s32 4294967295, %s3386_s21   ;;  %s2769_s23 = sadd.s32 4294967294, %s3386_s21   ;;  %s3386_s21 = sphi %s3508_s21, %s4157_s21   ;;  %s3382_s20 = sphi %s3506_s20, %s4156_s20   ;;  %s3378_s19 = sphi %s3504_s19, %s4155_s19   ;;  %s3374_s18 = sphi %s3502_s18, %s4154_s18  }
   0x8   : > { %s3527_s24 = sadd.s32 1, %s3386_s21   ;;  %s355_s25 = sadd.s32 1, %s3382_s20 }
   0x9   : > { %s352_s26 = ssub.s32 %s3386_s21, %s3527_s24  ;;  %p365_p0 = scmp.ne.s32.totalorder %s3382_s20, %s3378_s19 }
   0xa   : > { %p353_p1 = scmp.eq.s32.totalorder %s352_s26, 0  ;;  %p366_p2 = scmp.eq.s32.totalorder %s3523_s22, 1 }
   0xb   : > { %p371_p3 = scmp.ne.s32.totalorder %s3378_s19, %s3374_s18  ;;  %p372_p4 = scmp.eq.s32.totalorder %s2769_s23, 1 }
   0xc   : > { %s3538_s27 = scalar_select %p353_p1, %s3382_s20, %s355_s25  }
   0xd   : > { %p3540_p5 = por %p366_p2, %p365_p0  ;;  %p3544_p6 = por %p372_p4, %p371_p3 }
   0xe   : > { %4145 = sst [smem:[#allocation5_spill]] %s3538_s27  ;;  %p2772_p7 = scmp.ge.s32.totalorder %s3386_s21, 1 }
   0xf   : > { %p439_p8 = scmp.lt.s32.totalorder %s3386_s21, 3 }
  0x11   : > { %p440_p9 = pnand %p2772_p7, %p439_p8 }
  0x12   : > { %s4148_s1 = sld [smem:[#allocation7_spill]] (!%p440_p9)  ;;  %v3388_v1 = vmov (!%p440_p9), 0.0   ;;  %vm3389_vm0 = vmmov (!%p440_p9), 0   ;;  %p486_p10 = scmp.lt.s32.totalorder (!%p440_p9), %s3523_s22, 1  ;;  %vm516_vm1 = vcmask (!%p440_p9), 261120   ;;  %vm571_vm2 = vcmask (!%p440_p9), 31744  }
  0x13   : > { %443 = sbr.rel (%p440_p9) target bundleno = 2888 (0xb48), region = 80  ;;  %3025 = vmatprep.subr.bf16.mxu0 (!%p440_p9), %v3388_v1  ;;  %3033 = vmatprep.subr.bf16.mxu1 (!%p440_p9), %v3388_v1  ;;  %s4149_s0 = sld [smem:[#allocation6_spill]] (!%p440_p9)  ;;  %v563_v37 = vlaneseq (!%p440_p9)  ;;  %vm619_vm4 = vcmask (!%p440_p9), 64512   ;;  %vm637_vm5 = vcmask (!%p440_p9), 1043456   ;;  %vm1489_vm6 = vcmask (!%p440_p9), 97280  }
  0x14   : > { %3029 = vmatprep.mubr.msk.bf16.mxu0 (!%p440_p9), %vm3389_vm0, %v3388_v1  ;;  %3035 = vmatprep.mubr.msk.bf16.mxu1 (!%p440_p9), %vm3389_vm0, %v3388_v1  ;;  %s4150_s2 = sld [smem:[#allocation8_spill]] (!%p440_p9)  ;;  %s3392_s30 = smov (!%p440_p9), 92   ;;  %vm1491_vm7 = vcmask (!%p440_p9), 130048   ;;  %vm1493_vm8 = vcmask (!%p440_p9), 162816   ;;  %vm1495_vm9 = vcmask (!%p440_p9), 195584   ;;  %vm1497_vm10 = vcmask (!%p440_p9), 228352  }
  0x15   : > { %s3393_s16 = smov (!%p440_p9), 88   ;;  %s3394_s17 = smov (!%p440_p9), 120   ;;  %v3628_v38 = vshrl.u32 (!%p440_p9), %v563_v37, 7  ;;  %v566_v39 = vand.u32 (!%p440_p9), 127, %v563_v37 }
  0x16   : > { %s3395_s23 = smov (!%p440_p9), 84  }
  0x17   : > { %vm3631_vm3 = vcmp.le.s32.totalorder (!%p440_p9), %v566_v39, %v3628_v38 }
  0x18   : > { %v3217_v0 = vld [vmem:[%s4148_s1] sm:$0xff] (!%p440_p9)   ;;  %v3218_v2 = vld [vmem:[%s4148_s1 + $0x8] sm:$0xff] (!%p440_p9)   ;;  %s3397_s1 = smov (!%p440_p9), 80  }
  0x19   : > { %3026 = vmatpush3.bf16.msra.mxu0 (!%p440_p9), %v3217_v0 }
  0x1a   : > { %3027 = vmatprep.subr.bf16.mxu0 %v3388_v1  ;;  %s487_s25 = scalar_select %p486_p10, %s3523_s22, 1  ;;  %v2775_v5 = vld [vmem:[%s4150_s2] ss:$0 sm:$0xff] }
  0x1b   : > { %s3398_s2 = smov 112  }
  0x1c   : > { %s2774_s26 = sshll.u32 %s487_s25, 3  ;;  %s3390_s25 = smov 96  }
  0x1d   : > { %3028 = vmatpush3.bf16.msra.mxu0 %v3218_v2  ;;  %s3568_s27 = scalar_lea.vmem %s4149_s0, %s2774_s26  ;;  %s3391_s26 = smov 124  }
  0x1e   : > { %3039 = vmatprep.subr.bf16.mxu0 %v3388_v1  ;;  %v491_v3 = vld [vmem:[%s3568_s27] sm:$0xff]  ;;  %s3396_s0 = smov 116  }
  0x1f   : > { %v492_v4 = vpack.c.bf16 %v491_v3, %v491_v3 }
  0x21   : > { %3030 = vmatmul.mubr.msk.bf16.vlgmr.msra.gmra.mrb[0].mxu0 %vm516_vm1, %v492_v4 }
  0x22   : > { %3041 = vmatprep.mubr.msk.bf16.mxu0 %vm3389_vm0, %v3388_v1 }
  0xf4   : > { %v554_v6 = vpop.f32.mrb[0].mxu0 }
  0xf5   : > { %v555_v7 = vadd.f32 %v2775_v5, %v554_v6  ;;  %v3031_v8 = vpop.f32.mrb[1].mxu0 }
  0xf6   : > { %v557_v9 = vpop.f32.mrb[2].mxu0 }
  0xf7   : > { %v560_v10 = vmul.f32 0.5, %v555_v7  ;;  %v3578_v11 = vpack.c.bf16 %v555_v7, %v555_v7  ;;  %v3032_v12 = vpop.f32.mrb[3].mxu0 }
  0xf9   : > { %v561_v13 = vpack.c.bf16 %v560_v10, %v560_v10  ;;  %569 = vrot.lane.b32.xlu0 %v3578_v11, %s3390_s25  ;;  %s3399_s25 = smov 76  }
  0xfb   : > { %682 = vrot.lane.b32.xlu1 %v561_v13, %s3391_s26  ;;  %s3400_s26 = smov 108  }
  0xfd   : > { %684 = vrot.lane.b32.xlu0 %v3578_v11, %s3392_s30  ;;  %s3401_s30 = smov 72  }
  0xff   : > { %795 = vrot.lane.b32.xlu1 %v3578_v11, %s3393_s16  ;;  %s3402_s16 = smov 104  }
 0x101   : > { %793 = vrot.lane.b32.xlu0 %v561_v13, %s3394_s17  ;;  %s3403_s17 = smov 68  }
 0x103   : > { %906 = vrot.lane.b32.xlu1 %v3578_v11, %s3395_s23  ;;  %s3404_s23 = smov 100  }
 0x105   : > { %904 = vrot.lane.b32.xlu0 %v561_v13, %s3396_s0  ;;  %s3405_s0 = smov 60  }
 0x107   : > { %1017 = vrot.lane.b32.xlu1 %v3578_v11, %s3397_s1  ;;  %s3406_s1 = smov 64  }
 0x109   : > { %1015 = vrot.lane.b32.xlu0 %v561_v13, %s3398_s2  ;;  %s3407_s2 = smov 56  }
 0x10b   : > { %1128 = vrot.lane.b32.xlu1 %v3578_v11, %s3399_s25  ;;  %s3408_s25 = smov 52  }
 0x10d   : > { %1126 = vrot.lane.b32.xlu0 %v561_v13, %s3400_s26  ;;  %s3409_s26 = smov 44  }
 0x10f   : > { %1239 = vrot.lane.b32.xlu1 %v3578_v11, %s3401_s30  ;;  %s3410_s30 = smov 40  }
 0x111   : > { %1237 = vrot.lane.b32.xlu0 %v561_v13, %s3402_s16  ;;  %s3411_s16 = smov 36  }
 0x113   : > { %1350 = vrot.lane.b32.xlu1 %v3578_v11, %s3403_s17  ;;  %s3412_s17 = smov 48  }
 0x115   : > { %1348 = vrot.lane.b32.xlu0 %v561_v13, %s3404_s23  ;;  %s3413_s23 = smov 4  }
 0x16b   : > { %v570_v14 = vpop.permute.xlu0 %569 }
 0x16c   : > { %v576_v15 = vsel %vm571_vm2, %v570_v14, 0 }
 0x16d   : > { %3034 = vmatpush3.bf16.xpose.msra.mxu1 %v576_v15  ;;  %v683_v17 = vpop.permute.xlu1 %682 }
 0x16e   : > { %3045 = vmatprep.subr.bf16.mxu1 %v3388_v1 }
 0x16f   : > { %v685_v16 = vpop.permute.xlu0 %684 }
 0x170   : > { %v690_v18 = vsel %vm571_vm2, %v685_v16, 0 }
 0x171   : > { %v796_v19 = vpop.permute.xlu1 %795 }
 0x172   : > { %v801_v20 = vsel %vm571_vm2, %v796_v19, 0 }
 0x173   : > { %v794_v22 = vpop.permute.xlu0 %793 }
 0x174   : > { %3036 = vmatmul.mubr.msk.bf16.vlgmr.msra.gmra.mrb[0].mxu1 %vm571_vm2, %v561_v13 }
 0x175   : > { %3046 = vmatpush3.bf16.xpose.msra.mxu1 %v690_v18  ;;  %3047 = vmatprep.mubr.msk.bf16.mxu1 %vm3389_vm0, %v3388_v1  ;;  %v907_v21 = vpop.permute.xlu1 %906 }
 0x176   : > { %3057 = vmatprep.subr.bf16.mxu1 %v3388_v1  ;;  %v912_v23 = vsel %vm571_vm2, %v907_v21, 0 }
 0x177   : > { %v905_v25 = vpop.permute.xlu0 %904 }
 0x179   : > { %v1018_v24 = vpop.permute.xlu1 %1017 }
 0x17a   : > { %v1023_v26 = vsel %vm571_vm2, %v1018_v24, 0 }
 0x17b   : > { %v1016_v28 = vpop.permute.xlu0 %1015 }
 0x17c   : > { %3048 = vmatmul.mubr.msk.bf16.vlgmr.msra.gmra.mrb[4].mxu1 %vm571_vm2, %v683_v17 }
 0x17d   : > { %3058 = vmatpush3.bf16.xpose.msra.mxu1 %v801_v20  ;;  %3059 = vmatprep.mubr.msk.bf16.mxu1 %vm3389_vm0, %v3388_v1  ;;  %v1129_v27 = vpop.permute.xlu1 %1128 }
 0x17e   : > { %3069 = vmatprep.subr.bf16.mxu1 %v3388_v1  ;;  %v1134_v29 = vsel %vm571_vm2, %v1129_v27, 0 }
 0x17f   : > { %v1127_v31 = vpop.permute.xlu0 %1126 }
 0x181   : > { %v1240_v30 = vpop.permute.xlu1 %1239 }
 0x182   : > { %v1245_v32 = vsel %vm571_vm2, %v1240_v30, 0 }
 0x183   : > { %v1238_v34 = vpop.permute.xlu0 %1237 }
 0x184   : > { %3060 = vmatmul.mubr.msk.bf16.vlgmr.msra.gmra.mrb[8].mxu1 %vm571_vm2, %v794_v22 }
 0x185   : > { %3070 = vmatpush3.bf16.xpose.msra.mxu1 %v912_v23  ;;  %3071 = vmatprep.mubr.msk.bf16.mxu1 %vm3389_vm0, %v3388_v1  ;;  %v1351_v33 = vpop.permute.xlu1 %1350 }
 0x186   : > { %3081 = vmatprep.subr.bf16.mxu1 %v3388_v1  ;;  %v1356_v35 = vsel %vm571_vm2, %v1351_v33, 0 }
 0x187   : > { %v1349_v36 = vpop.permute.xlu0 %1348 }
 0x18c   : > { %3072 = vmatmul.mubr.msk.bf16.vlgmr.msra.gmra.mrb[12].mxu1 %vm571_vm2, %v905_v25 }
 0x18d   : > { %3082 = vmatpush3.bf16.xpose.msra.mxu1 %v1023_v26  ;;  %3083 = vmatprep.mubr.msk.bf16.mxu1 %vm3389_vm0, %v3388_v1 }
 0x18e   : > { %3093 = vmatprep.subr.bf16.mxu1 %v3388_v1 }
 0x194   : > { %3084 = vmatmul.mubr.msk.bf16.vlgmr.msra.gmra.mrb[16].mxu1 %vm571_vm2, %v1016_v28 }
 0x195   : > { %3094 = vmatpush3.bf16.xpose.msra.mxu1 %v1134_v29  ;;  %3095 = vmatprep.mubr.msk.bf16.mxu1 %vm3389_vm0, %v3388_v1 }
 0x196   : > { %3105 = vmatprep.subr.bf16.mxu1 %v3388_v1 }
 0x19c   : > { %3096 = vmatmul.mubr.msk.bf16.vlgmr.msra.gmra.mrb[20].mxu1 %vm571_vm2, %v1127_v31 }
 0x19d   : > { %3106 = vmatpush3.bf16.xpose.msra.mxu1 %v1245_v32  ;;  %3107 = vmatprep.mubr.msk.bf16.mxu1 %vm3389_vm0, %v3388_v1 }
 0x19e   : > { %3117 = vmatprep.subr.bf16.mxu1 %v3388_v1 }
 0x1a4   : > { %3108 = vmatmul.mubr.msk.bf16.vlgmr.msra.gmra.mrb[24].mxu1 %vm571_vm2, %v1238_v34 }
 0x1a5   : > { %3118 = vmatpush3.bf16.xpose.msra.mxu1 %v1356_v35  ;;  %3119 = vmatprep.mubr.msk.bf16.mxu1 %vm3389_vm0, %v3388_v1 }
 0x1a6   : > { %3129 = vmatprep.subr.bf16.mxu1 %v3388_v1 }
 0x1ac   : > { %3120 = vmatmul.mubr.msk.bf16.vlgmr.msra.gmra.mrb[28].mxu1 %vm571_vm2, %v1349_v36 }
 0x1ad   : > { %3133 = vmatprep.mubr.msk.bf16.mxu1 %vm3389_vm0, %v3388_v1 }
 0x247   : > { %v612_v41 = vpop.f32.mrb[0].mxu1 }
 0x248   : > { %v3637_v42 = vsel %vm3631_vm3, %v612_v41, -1e+30  ;;  %v3037_v43 = vpop.f32.mrb[1].mxu1 }
 0x249   : > { %v615_v44 = vpop.f32.mrb[2].mxu1  ;;  %v620_v45 = vsel %vm619_vm4, %v3637_v42, -inf }
 0x24a   : > { %621 = vmax.xlane.f32.xlu1 %v620_v45  ;;  %v3038_v46 = vpop.f32.mrb[3].mxu1 }
 0x24f   : > { %v726_v47 = vpop.f32.mrb[4].mxu1 }
 0x250   : > { %v732_v48 = vsel %vm3631_vm3, %v726_v47, -1e+30  ;;  %v3049_v49 = vpop.f32.mrb[5].mxu1 }
 0x251   : > { %v729_v50 = vpop.f32.mrb[6].mxu1  ;;  %v733_v51 = vsel %vm619_vm4, %v732_v48, -inf }
 0x252   : > { %734 = vmax.xlane.f32.xlu0 %v733_v51  ;;  %v3050_v52 = vpop.f32.mrb[7].mxu1 }
 0x257   : > { %v837_v53 = vpop.f32.mrb[8].mxu1 }
 0x258   : > { %v843_v54 = vsel %vm3631_vm3, %v837_v53, -1e+30  ;;  %v3061_v55 = vpop.f32.mrb[9].mxu1 }
 0x259   : > { %v840_v56 = vpop.f32.mrb[10].mxu1  ;;  %v844_v57 = vsel %vm619_vm4, %v843_v54, -inf }
 0x25a   : > { %845 = vmax.xlane.f32.xlu0 %v844_v57  ;;  %v3062_v58 = vpop.f32.mrb[11].mxu1 }
 0x25f   : > { %v948_v59 = vpop.f32.mrb[12].mxu1 }
 0x260   : > { %v954_v60 = vsel %vm3631_vm3, %v948_v59, -1e+30  ;;  %v3073_v61 = vpop.f32.mrb[13].mxu1 }
 0x261   : > { %v951_v62 = vpop.f32.mrb[14].mxu1  ;;  %v955_v63 = vsel %vm619_vm4, %v954_v60, -inf }
 0x262   : > { %956 = vmax.xlane.f32.xlu1 %v955_v63  ;;  %v3074_v0 = vpop.f32.mrb[15].mxu1 }
 0x267   : > { %v1059_v2 = vpop.f32.mrb[16].mxu1 }
 0x268   : > { %v1065_v3 = vsel %vm3631_vm3, %v1059_v2, -1e+30  ;;  %v3085_v4 = vpop.f32.mrb[17].mxu1 }
 0x269   : > { %v1062_v5 = vpop.f32.mrb[18].mxu1  ;;  %v1066_v6 = vsel %vm619_vm4, %v1065_v3, -inf }
 0x26a   : > { %1067 = vmax.xlane.f32.xlu0 %v1066_v6  ;;  %v3086_v7 = vpop.f32.mrb[19].mxu1 }
 0x26f   : > { %v1170_v8 = vpop.f32.mrb[20].mxu1 }
 0x270   : > { %v3655_v9 = vsel %vm3631_vm3, %v1170_v8, -1e+30  ;;  %v3097_v10 = vpop.f32.mrb[21].mxu1 }
 0x271   : > { %v1173_v12 = vpop.f32.mrb[22].mxu1  ;;  %v1177_v13 = vsel %vm619_vm4, %v3655_v9, -inf }
 0x272   : > { %1178 = vmax.xlane.f32.xlu1 %v1177_v13  ;;  %v3098_v14 = vpop.f32.mrb[23].mxu1 }
 0x277   : > { %v1281_v15 = vpop.f32.mrb[24].mxu1 }
 0x278   : > { %v1287_v16 = vsel %vm3631_vm3, %v1281_v15, -1e+30  ;;  %v3109_v17 = vpop.f32.mrb[25].mxu1 }
 0x279   : > { %v1284_v18 = vpop.f32.mrb[26].mxu1  ;;  %v1288_v19 = vsel %vm619_vm4, %v1287_v16, -inf }
 0x27a   : > { %1289 = vmax.xlane.f32.xlu0 %v1288_v19  ;;  %v3110_v20 = vpop.f32.mrb[27].mxu1 }
 0x27f   : > { %v1392_v21 = vpop.f32.mrb[28].mxu1 }
 0x280   : > { %v3664_v22 = vsel %vm3631_vm3, %v1392_v21, -1e+30  ;;  %v3121_v23 = vpop.f32.mrb[29].mxu1 }
 0x281   : > { %v1395_v24 = vpop.f32.mrb[30].mxu1  ;;  %v1399_v26 = vsel %vm619_vm4, %v3664_v22, -inf }
 0x282   : > { %v3122_v25 = vpop.f32.mrb[31].mxu1 }
 0x283   : > { %745 = vrot.lane.b32.xlu1 %v3578_v11, %s3405_s0  ;;  %s3414_s0 = smov 8  }
 0x290   : > { %632 = vrot.lane.b32.xlu0 %v3578_v11, %s3406_s1  ;;  %s3415_s1 = smov 12  }
 0x2a7   : > { %1400 = vmax.xlane.f32.xlu1 %v1399_v26 }
 0x2b8   : > { %856 = vrot.lane.b32.xlu1 %v3578_v11, %s3407_s2  ;;  %s3416_s2 = smov 16  }
 0x2d7   : > { %v622_v27 = vpop.xlane.xlu1 %621 }
 0x2d8   : > { %v623_v28 = vsub.f32 %v3637_v42, %v622_v27 }
 0x2da   : > { %v624_v29 = vmul.f32 1.442695, %v623_v28 }
 0x2dc   : > { %3287 = vpow2.f32 %v624_v29 }
 0x2df   : > { %v735_v30 = vpop.xlane.xlu0 %734 }
 0x2e0   : > { %v736_v31 = vsub.f32 %v732_v48, %v735_v30 }
 0x2e2   : > { %v737_v32 = vmul.f32 1.442695, %v736_v31 }
 0x2e4   : > { %3289 = vpow2.f32 %v737_v32 }
 0x2e6   : > { %v3672_v33 = vpop.eup %3287 }
 0x2e7   : > { %v846_v34 = vpop.xlane.xlu0 %845  ;;  %v626_v35 = vsel %vm619_vm4, %v3672_v33, 0.0 }
 0x2e8   : > { %v847_v36 = vsub.f32 %v843_v54, %v846_v34  ;;  %627 = vadd.xlane.f32.xlu0 %v626_v35 }
 0x2ea   : > { %v848_v37 = vmul.f32 1.442695, %v847_v36 }
 0x2ec   : > { %3291 = vpow2.f32 %v848_v37 }
 0x2ee   : > { %v3676_v39 = vpop.eup %3289 }
 0x2ef   : > { %v957_v40 = vpop.xlane.xlu1 %956  ;;  %v739_v41 = vsel %vm619_vm4, %v3676_v39, 0.0 }
 0x2f0   : > { %v958_v42 = vsub.f32 %v954_v60, %v957_v40  ;;  %740 = vadd.xlane.f32.xlu1 %v739_v41 }
 0x2f2   : > { %v959_v43 = vmul.f32 1.442695, %v958_v42 }
 0x2f4   : > { %3293 = vpow2.f32 %v959_v43 }
 0x2f6   : > { %v3680_v44 = vpop.eup %3291 }
 0x2f7   : > { %v1068_v45 = vpop.xlane.xlu0 %1067  ;;  %v850_v46 = vsel %vm619_vm4, %v3680_v44, 0.0 }
 0x2f8   : > { %v1069_v47 = vsub.f32 %v1065_v3, %v1068_v45  ;;  %851 = vadd.xlane.f32.xlu0 %v850_v46 }
 0x2fa   : > { %v1070_v48 = vmul.f32 1.442695, %v1069_v47 }
 0x2fc   : > { %3295 = vpow2.f32 %v1070_v48 }
 0x2fe   : > { %v3684_v49 = vpop.eup %3293 }
 0x2ff   : > { %v961_v50 = vsel %vm619_vm4, %v3684_v49, 0.0  ;;  %v1179_v58 = vpop.xlane.xlu1 %1178 }
 0x300   : > { %962 = vadd.xlane.f32.xlu1 %v961_v50  ;;  %v1180_v60 = vsub.f32 %v3655_v9, %v1179_v58 }
 0x302   : > { %v1181_v62 = vmul.f32 1.442695, %v1180_v60 }
 0x303   : > { %v746_v2 = vpop.permute.xlu1 %745 }
 0x304   : > { %v751_v15 = vsel %vm637_vm5, %v746_v2, 0 }
 0x306   : > { %v3688_v51 = vpop.eup %3295 }
 0x307   : > { %v1290_v52 = vpop.xlane.xlu0 %1289  ;;  %v1072_v53 = vsel %vm619_vm4, %v3688_v51, 0.0 }
 0x308   : > { %v1291_v54 = vsub.f32 %v1287_v16, %v1290_v52  ;;  %1073 = vadd.xlane.f32.xlu1 %v1072_v53 }
 0x30a   : > { %v1292_v55 = vmul.f32 1.442695, %v1291_v54 }
 0x30b   : > { %v633_v56 = vpop.permute.xlu0 %632 }
 0x30c   : > { %3297 = vpow2.f32 %v1292_v55  ;;  %v639_v57 = vsel %vm637_vm5, %v633_v56, 0 }
 0x30d   : > { %3040 = vmatpush3.bf16.msra.mxu0 %v639_v57  ;;  %3299 = vpow2.f32 %v1181_v62 }
 0x30e   : > { %967 = vrot.lane.b32.xlu0 %v3578_v11, %s3408_s25  ;;  %3051 = vmatprep.subr.bf16.mxu0 %v3388_v1  ;;  %s2893_s25 = sshll.u32 %s3523_s22, 7 }
 0x316   : > { %v3695_v59 = vpop.eup %3297 }
 0x317   : > { %v1294_v61 = vsel %vm619_vm4, %v3695_v59, 0.0  ;;  %v3700_v63 = vpop.eup %3299 }
 0x318   : > { %1295 = vadd.xlane.f32.xlu1 %v1294_v61  ;;  %v1183_v0 = vsel %vm619_vm4, %v3700_v63, 0.0 }
 0x32d   : > { %1184 = vadd.xlane.f32.xlu0 %v1183_v0 }
 0x334   : > { %v1401_v3 = vpop.xlane.xlu1 %1400 }
 0x335   : > { %v1402_v4 = vsub.f32 %v3664_v22, %v1401_v3 }
 0x337   : > { %v1403_v5 = vmul.f32 1.442695, %v1402_v4 }
 0x338   : > { %v857_v9 = vpop.permute.xlu1 %856 }
 0x339   : > { %3301 = vpow2.f32 %v1403_v5  ;;  %v862_v19 = vsel %vm637_vm5, %v857_v9, 0 }
 0x343   : > { %v3705_v6 = vpop.eup %3301  ;;  %1189 = vrot.lane.b32.xlu0 %v3578_v11, %s3409_s26 }
 0x344   : > { %v1405_v7 = vsel %vm619_vm4, %v3705_v6, 0.0 }
 0x345   : > { %1406 = vadd.xlane.f32.xlu1 %v1405_v7 }
 0x347   : > { %1300 = vrot.lane.b32.xlu0 %v3578_v11, %s3410_s30  ;;  %s3417_s30 = smov 20  }
 0x34b   : > { %1411 = vrot.lane.b32.xlu0 %v3578_v11, %s3411_s16 }
 0x356   : > { %1078 = vrot.lane.b32.xlu1 %v3578_v11, %s3412_s17  ;;  %s4084_s17 = scalar_lea.hbm %s4141_s15, %s2893_s25 }
 0x375   : > { %v628_v8 = vpop.xlane.xlu0 %627 }
 0x376   : > { %3303 = vrcp.f32 %v628_v8 }
 0x37d   : > { %v741_v10 = vpop.xlane.xlu1 %740 }
 0x37e   : > { %3305 = vrcp.f32 %v741_v10 }
 0x380   : > { %v3304_v12 = vpop.eup %3303 }
 0x381   : > { %v630_v13 = vmul.f32 %v3304_v12, %v3672_v33  ;;  %v3219_v12 = vld [vmem:[%s4129_s3] sm:$0xff]  }
 0x382   : > { %3130 = vmatpush3.bf16.msra.mxu1 %v3219_v12  ;;  %v1601_v12 = vld [vmem:[%s4133_s7 + $0x18] sm:$0xff] }
 0x383   : > { %v631_v14 = vpack.c.bf16 %v630_v13, %v630_v13  ;;  %3131 = vmatprep.subr.bf16.mxu1 %v3388_v1 }
 0x385   : > { %3042 = vmatmul.mubr.msk.bf16.vlgmr.msra.gmra.mrb[4].mxu0 %vm619_vm4, %v631_v14  ;;  %v852_v16 = vpop.xlane.xlu0 %851 }
 0x386   : > { %3052 = vmatpush3.bf16.msra.mxu0 %v751_v15  ;;  %3307 = vrcp.f32 %v852_v16  ;;  %3053 = vmatprep.mubr.msk.bf16.mxu0 %vm3389_vm0, %v3388_v1 }
 0x387   : > { %3063 = vmatprep.subr.bf16.mxu0 %v3388_v1 }
 0x388   : > { %v3306_v11 = vpop.eup %3305 }
 0x389   : > { %v743_v17 = vmul.f32 %v3306_v11, %v3676_v39  ;;  %v968_v23 = vpop.permute.xlu0 %967  ;;  %v3220_v11 = vld [vmem:[%s4129_s3 + $0x8] sm:$0xff]  }
 0x38a   : > { %v973_v25 = vsel %vm637_vm5, %v968_v23, 0  ;;  %3132 = vmatpush3.bf16.msra.mxu1 %v3220_v11 }
 0x38b   : > { %v744_v18 = vpack.c.bf16 %v743_v17, %v743_v17 }
 0x38d   : > { %3054 = vmatmul.mubr.msk.bf16.vlgmr.msra.gmra.mrb[8].mxu0 %vm619_vm4, %v744_v18  ;;  %v963_v20 = vpop.xlane.xlu1 %962 }
 0x38e   : > { %3064 = vmatpush3.bf16.msra.mxu0 %v862_v19  ;;  %3309 = vrcp.f32 %v963_v20  ;;  %3065 = vmatprep.mubr.msk.bf16.mxu0 %vm3389_vm0, %v3388_v1 }
 0x38f   : > { %3075 = vmatprep.subr.bf16.mxu0 %v3388_v1 }
 0x390   : > { %v3308_v21 = vpop.eup %3307 }
 0x391   : > { %v854_v22 = vmul.f32 %v3308_v21, %v3680_v44 }
 0x393   : > { %v855_v24 = vpack.c.bf16 %v854_v22, %v854_v22 }
 0x395   : > { %3066 = vmatmul.mubr.msk.bf16.vlgmr.msra.gmra.mrb[12].mxu0 %vm619_vm4, %v855_v24  ;;  %v1074_v29 = vpop.xlane.xlu1 %1073 }
 0x396   : > { %3076 = vmatpush3.bf16.msra.mxu0 %v973_v25  ;;  %3077 = vmatprep.mubr.msk.bf16.mxu0 %vm3389_vm0, %v3388_v1  ;;  %3311 = vrcp.f32 %v1074_v29 }
 0x397   : > { %3087 = vmatprep.subr.bf16.mxu0 %v3388_v1 }
 0x398   : > { %v3310_v26 = vpop.eup %3309 }
 0x399   : > { %v965_v27 = vmul.f32 %v3310_v26, %v3684_v49 }
 0x39b   : > { %v966_v28 = vpack.c.bf16 %v965_v27, %v965_v27 }
 0x39d   : > { %3078 = vmatmul.mubr.msk.bf16.vlgmr.msra.gmra.mrb[16].mxu0 %vm619_vm4, %v966_v28 }
 0x39e   : > { %3089 = vmatprep.mubr.msk.bf16.mxu0 %vm3389_vm0, %v3388_v1 }
 0x3a0   : > { %v3312_v32 = vpop.eup %3311 }
 0x3a1   : > { %v1076_v34 = vmul.f32 %v3312_v32, %v3688_v51 }
 0x3a3   : > { %v1077_v39 = vpack.c.bf16 %v1076_v34, %v1076_v34 }
 0x3a5   : > { %v1296_v31 = vpop.xlane.xlu1 %1295 }
 0x3ba   : > { %v1185_v30 = vpop.xlane.xlu0 %1184 }
 0x3bb   : > { %3313 = vrcp.f32 %v1185_v30 }
 0x3bc   : > { %3315 = vrcp.f32 %v1296_v31 }
 0x3be   : > { %v1190_v37 = vpop.permute.xlu0 %1189 }
 0x3bf   : > { %v1195_v41 = vsel %vm637_vm5, %v1190_v37, 0 }
 0x3c2   : > { %v1301_v43 = vpop.permute.xlu0 %1300 }
 0x3c3   : > { %v1306_v46 = vsel %vm637_vm5, %v1301_v43, 0 }
 0x3c5   : > { %v3314_v40 = vpop.eup %3313 }
 0x3c6   : > { %v1187_v42 = vmul.f32 %v3314_v40, %v3700_v63  ;;  %v3316_v45 = vpop.eup %3315  ;;  %v1412_v48 = vpop.permute.xlu0 %1411 }
 0x3c7   : > { %v1298_v47 = vmul.f32 %v3316_v45, %v3695_v59  ;;  %v1417_v51 = vsel %vm637_vm5, %v1412_v48, 0 }
 0x3c8   : > { %v1188_v44 = vpack.c.bf16 %v1187_v42, %v1187_v42 }
 0x3c9   : > { %v1299_v49 = vpack.c.bf16 %v1298_v47, %v1298_v47  ;;  %v3323_v47 = vld [vmem:[%s3568_s27] sm:$0xff] }
 0x3d2   : > { %v1407_v33 = vpop.xlane.xlu1 %1406 }
 0x3d3   : > { %3317 = vrcp.f32 %v1407_v33 }
 0x3d6   : > { %v1079_v35 = vpop.permute.xlu1 %1078 }
 0x3d7   : > { %v1084_v36 = vsel %vm637_vm5, %v1079_v35, 0 }
 0x3d8   : > { %3088 = vmatpush3.bf16.msra.mxu0 %v1084_v36 }
 0x3d9   : > { %3099 = vmatprep.subr.bf16.mxu0 %v3388_v1 }
 0x3db   : > { %3090 = vmatmul.mubr.msk.bf16.vlgmr.msra.gmra.mrb[20].mxu0 %vm619_vm4, %v1077_v39 }
 0x3dc   : > { %3100 = vmatpush3.bf16.msra.mxu0 %v1195_v41  ;;  %3101 = vmatprep.mubr.msk.bf16.mxu0 %vm3389_vm0, %v3388_v1  ;;  %v2795_v41 = vld [vmem:[%s4130_s4] ss:$0 sm:$0xff] }
 0x3dd   : > { %3111 = vmatprep.subr.bf16.mxu0 %v3388_v1  ;;  %v3318_v50 = vpop.eup %3317 }
 0x3de   : > { %v1409_v52 = vmul.f32 %v3318_v50, %v3705_v6 }
 0x3e0   : > { %v1410_v53 = vpack.c.bf16 %v1409_v52, %v1409_v52 }
 0x3e3   : > { %3102 = vmatmul.mubr.msk.bf16.vlgmr.msra.gmra.mrb[24].mxu0 %vm619_vm4, %v1188_v44 }
 0x3e4   : > { %3112 = vmatpush3.bf16.msra.mxu0 %v1306_v46  ;;  %3113 = vmatprep.mubr.msk.bf16.mxu0 %vm3389_vm0, %v3388_v1 }
 0x3e5   : > { %3123 = vmatprep.subr.bf16.mxu0 %v3388_v1 }
 0x3eb   : > { %3114 = vmatmul.mubr.msk.bf16.vlgmr.msra.gmra.mrb[28].mxu0 %vm619_vm4, %v1299_v49 }
 0x3ec   : > { %3124 = vmatpush3.bf16.msra.mxu0 %v1417_v51  ;;  %3125 = vmatprep.mubr.msk.bf16.mxu0 %vm3389_vm0, %v3388_v1 }
 0x3f3   : > { %3126 = vmatmul.mubr.msk.bf16.vlgmr.msra.gmra.mrb[32].mxu0 %vm619_vm4, %v1410_v53 }
 0x458   : > { %v675_v54 = vpop.f32.mrb[4].mxu0 }
 0x459   : > { %v3043_v55 = vpop.f32.mrb[5].mxu0 }
 0x45a   : > { %v678_v56 = vpop.f32.mrb[6].mxu0  ;;  %v1598_v55 = vld [vmem:[%s4133_s7] sm:$0xff] }
 0x45b   : > { %v3044_v57 = vpop.f32.mrb[7].mxu0  ;;  %v1602_v56 = vld [vmem:[%s4133_s7 + $0x20] sm:$0xff] }
 0x45c   : > { %v1599_v57 = vld [vmem:[%s4133_s7 + $0x8] sm:$0xff] }
 0x460   : > { %v787_v58 = vpop.f32.mrb[8].mxu0 }
 0x461   : > { %1460 = vrot.lane.b32.xlu1 %v787_v58, %s3413_s23  ;;  %v3055_v59 = vpop.f32.mrb[9].mxu0  ;;  %s3418_s23 = smov 24   ;;  %v2802_v58 = vcombine.high %v1598_v55, %v1602_v56 }
 0x462   : > { %v790_v60 = vpop.f32.mrb[10].mxu0  ;;  %v1603_v59 = vld [vmem:[%s4133_s7 + $0x28] sm:$0xff] }
 0x463   : > { %v3056_v61 = vpop.f32.mrb[11].mxu0  ;;  %v2801_v60 = vcombine.low %v1598_v55, %v1602_v56  ;;  %1739 = vmatprep.subr.bf16.mxu0 %v2802_v58  ;;  %v3240_v55 = vld [vmem:[%s4135_s9 + $0xa0] sm:$0xff]   ;;  %v3241_v56 = vld [vmem:[%s4135_s9 + $0x68] sm:$0xff]  }
 0x464   : > { %v2803_v61 = vcombine.low %v1599_v57, %v1603_v59  ;;  %v3243_v58 = vld [vmem:[%s4135_s9 + $0x28] sm:$0xff]  }
 0x465   : > { %1740 = vmatpush1.bf16.msra.mxu0 %v2801_v60  ;;  %v3245_v60 = vld [vmem:[%s4135_s9 + $0x70] sm:$0xff]  }
 0x468   : > { %v898_v62 = vpop.f32.mrb[12].mxu0 }
 0x469   : > { %1464 = vrot.lane.b32.xlu0 %v898_v62, %s3414_s0  ;;  %v3067_v63 = vpop.f32.mrb[13].mxu0  ;;  %s3419_s0 = smov 28   ;;  %v2804_v62 = vcombine.high %v1599_v57, %v1603_v59  ;;  %v3242_v57 = vld [vmem:[%s4135_s9 + $0xe8] sm:$0xff]  }
 0x46a   : > { %v901_v0 = vpop.f32.mrb[14].mxu0  ;;  %v1606_v63 = vld [vmem:[%s4133_s7 + $0x40] sm:$0xff]  ;;  %v3244_v59 = vld [vmem:[%s4135_s9 + $0xa8] sm:$0xff]  }
 0x46b   : > { %v3068_v2 = vpop.f32.mrb[15].mxu0  ;;  %1780 = vmatprep.subr.bf16.mxu1 %v2804_v62  ;;  %v1610_v0 = vld [vmem:[%s4133_s7 + $0x60] sm:$0xff]  ;;  %v3247_v62 = vld [vmem:[%s4135_s9 + $0x30] sm:$0xff]  }
 0x46c   : > { %v1607_v2 = vld [vmem:[%s4133_s7 + $0x48] sm:$0xff] }
 0x470   : > { %v1009_v3 = vpop.f32.mrb[16].mxu0 }
 0x471   : > { %1468 = vrot.lane.b32.xlu1 %v1009_v3, %s3415_s1  ;;  %v3079_v4 = vpop.f32.mrb[17].mxu0  ;;  %v2809_v3 = vcombine.low %v1606_v63, %v1610_v0 }
 0x472   : > { %v1012_v5 = vpop.f32.mrb[18].mxu0  ;;  %v2810_v4 = vcombine.high %v1606_v63, %v1610_v0  ;;  %v3248_v63 = vld [vmem:[%s4135_s9 + $0xb0] sm:$0xff]   ;;  %v3249_v0 = vld [vmem:[%s4135_s9 + $0x78] sm:$0xff]  }
 0x473   : > { %v3080_v6 = vpop.f32.mrb[19].mxu0  ;;  %v1611_v5 = vld [vmem:[%s4133_s7 + $0x68] sm:$0xff] }
 0x474   : > { %v3420_v6 = vmov 0   ;;  %1741 = vmatprep.subr.bf16.mxu0 %v2810_v4  ;;  %v3252_v4 = vld [vmem:[%s4135_s9 + $0xb8] sm:$0xff]  }
 0x475   : > { %1771 = vmatprep.mubr.bf16.mxu0 %v3420_v6  ;;  %1742 = vmatpush1.bf16.msra.mxu0 %v2809_v3  ;;  %v3251_v3 = vld [vmem:[%s4135_s9 + $0x38] sm:$0xff]  }
 0x4ae   : > { %v1120_v7 = vpop.f32.mrb[20].mxu0 }
 0x4af   : > { %1472 = vrot.lane.b32.xlu0 %v1120_v7, %s3416_s2  ;;  %v3091_v8 = vpop.f32.mrb[21].mxu0  ;;  %v2811_v7 = vcombine.low %v1607_v2, %v1611_v5 }
 0x4b0   : > { %v1123_v9 = vpop.f32.mrb[22].mxu0  ;;  %v2812_v8 = vcombine.high %v1607_v2, %v1611_v5  ;;  %v3250_v2 = vld [vmem:[%s4135_s9 + $0xf8] sm:$0xff]   ;;  %v3253_v5 = vld [vmem:[%s4135_s9 + $0x140] sm:$0xff]  }
 0x4b1   : > { %v3092_v10 = vpop.f32.mrb[23].mxu0  ;;  %v1600_v9 = vld [vmem:[%s4133_s7 + $0x10] sm:$0xff] }
 0x4b2   : > { %v1604_v10 = vld [vmem:[%s4133_s7 + $0x30] sm:$0xff] }
 0x4b6   : > { %v1231_v13 = vpop.f32.mrb[24].mxu0 }
 0x4b7   : > { %1476 = vrot.lane.b32.xlu1 %v1231_v13, %s3417_s30  ;;  %v3103_v14 = vpop.f32.mrb[25].mxu0  ;;  %v2806_v13 = vcombine.high %v1600_v9, %v1604_v10 }
 0x4b8   : > { %v1234_v15 = vpop.f32.mrb[26].mxu0  ;;  %v1605_v14 = vld [vmem:[%s4133_s7 + $0x38] sm:$0xff] }
 0x4b9   : > { %v3104_v16 = vpop.f32.mrb[27].mxu0  ;;  %v2805_v15 = vcombine.low %v1600_v9, %v1604_v10  ;;  %v2808_v11 = vcombine.high %v1601_v12, %v1605_v14  ;;  %1821 = vmatprep.subr.bf16.mxu0 %v2806_v13  ;;  %v3941_v9 = vld [vmem:[%s4134_s8] sm:$0xff]  ;;  %v1622_v10 = vsub.s32 1, %v3628_v38 }
 0x4ba   : > { %v2807_v16 = vcombine.low %v1601_v12, %v1605_v14  ;;  %v1630_v12 = vsub.s32 3, %v3628_v38 }
 0x4be   : > { %v1342_v17 = vpop.f32.mrb[28].mxu0 }
 0x4bf   : > { %1480 = vrot.lane.b32.xlu0 %v1342_v17, %s3418_s23  ;;  %v3115_v18 = vpop.f32.mrb[29].mxu0  ;;  %s483_s23 = sand.u32 1, %s3378_s19  }
 0x4c0   : > { %v1345_v19 = vpop.f32.mrb[30].mxu0  ;;  %s2697_s1 = scalar_lea.sflag [#allocation3], %s483_s23 }
 0x4c1   : > { %v3116_v20 = vpop.f32.mrb[31].mxu0 }
 0x4c6   : > { %v1453_v21 = vpop.f32.mrb[32].mxu0 }
 0x4c7   : > { %1484 = vrot.lane.b32.xlu1 %v1453_v21, %s3419_s0  ;;  %v3127_v22 = vpop.f32.mrb[33].mxu0  ;;  %v2799_v21 = vld [vmem:[%s4131_s5] ss:$0 sm:$0xff]  ;;  %s2773_s0 = sshll.u32 %s483_s23, 3 }
 0x4c8   : > { %v1456_v23 = vpop.f32.mrb[34].mxu0  ;;  %s485_s26 = scalar_lea.vmem [#allocation2], %s2773_s0  ;;  %s3421_s0 = smov [#allocation2]  }
 0x4c9   : > { %v3128_v24 = vpop.f32.mrb[35].mxu0  ;;  %v2800_v23 = vld [vmem:[%s4132_s6] ss:$0 sm:$0xff]  ;;  %s2710_s30 = sshll.u32 %s485_s26, 4  ;;  %s3328_s2 = sshll.u32 %s3421_s0, 4  ;;  %s4086_s30 = int_to_ptr.vmem [resolvable:$true] %s2710_s30  ;;  %s3329_s2 = int_to_ptr.vmem [resolvable:$false] %s3328_s2 }
 0x4ca   : > { %s3324_s22 = scalar_lea.vmem %s4086_s30, 128  ;;  %s3330_s16 = scalar_lea.vmem %s3329_s2, 256 }
 0x4cb   : > { %p3325_p11 = scmp.ne.s32.totalorder %s4086_s30, %s3324_s22  ;;  %p3331_p0 = scmp.lt.s32.totalorder %s4086_s30, %s3329_s2 }
 0x4cc   : > { %p3332_p1 = scmp.lt.s32.totalorder %s3330_s16, %s3324_s22 }
 0x4cd   : > { %p3326_p12 = pnand %p3325_p11, %p3540_p5 }
 0x4ce   : > { %p3333_p2 = por %p3332_p1, %p3331_p0 }
 0x4cf   : > { %p3327_p13 = pneg %p3326_p12 }
 0x4d1   : > { %p3334_p3 = pnand %p3333_p2, %p3327_p13 }
 0x4d3   : > { %v1461_v25 = vpop.permute.xlu1 %1460 }
 0x4d4   : > { %v1487_v29 = vsel %vm571_vm2, %v675_v54, %v1461_v25  ;;  %v1608_v25 = vld [vmem:[%s4133_s7 + $0x50] sm:$0xff] }
 0x4db   : > { %v1465_v26 = vpop.permute.xlu0 %1464 }
 0x4dc   : > { %v1488_v30 = vsel %vm619_vm4, %v1487_v29, %v1465_v26  ;;  %v1612_v26 = vld [vmem:[%s4133_s7 + $0x70] sm:$0xff] }
 0x4e3   : > { %v1469_v27 = vpop.permute.xlu1 %1468 }
 0x4e4   : > { %v1490_v32 = vsel %vm1489_vm6, %v1488_v30, %v1469_v27  ;;  %v1609_v27 = vld [vmem:[%s4133_s7 + $0x58] sm:$0xff] }
 0x521   : > { %v1473_v28 = vpop.permute.xlu0 %1472 }
 0x522   : > { %v1492_v34 = vsel %vm1491_vm7, %v1490_v32, %v1473_v28  ;;  %v1613_v28 = vld [vmem:[%s4133_s7 + $0x78] sm:$0xff] }
 0x523   : > { %v2816_v32 = vcombine.high %v1609_v27, %v1613_v28 }
 0x529   : > { %v1477_v31 = vpop.permute.xlu1 %1476 }
 0x52a   : > { %v1494_v35 = vsel %vm1493_vm8, %v1492_v34, %v1477_v31  ;;  %v2814_v31 = vcombine.high %v1608_v25, %v1612_v26  ;;  %v2815_v34 = vcombine.low %v1609_v27, %v1613_v28  ;;  %v1646_v27 = vsub.s32 7, %v3628_v38 }
 0x531   : > { %v1481_v33 = vpop.permute.xlu0 %1480 }
 0x532   : > { %v1496_v36 = vsel %vm1495_vm9, %v1494_v35, %v1481_v33  ;;  %v2813_v33 = vcombine.low %v1608_v25, %v1612_v26  ;;  %v3221_v35 = vld [vmem:[%s4135_s9 + $0x40] sm:$0xff]   ;;  %v1638_v26 = vsub.s32 5, %v3628_v38 }
 0x539   : > { %v1485_v37 = vpop.permute.xlu1 %1484 }
 0x53a   : > { %v1498_v39 = vsel %vm1497_vm10, %v1496_v36, %v1485_v37  ;;  %v3222_v36 = vld [vmem:[%s4135_s9 + $0xc0] sm:$0xff]  }
 0x53b   : > { %v1499_v40 = vpack.c.bf16 %v1498_v39, %v1498_v39  ;;  %v3223_v37 = vld [vmem:[%s4135_s9] sm:$0xff]  }
 0x53c   : > { %v3224_v39 = vld [vmem:[%s4135_s9 + $0x80] sm:$0xff]  }
 0x53d   : > { %3134 = vmatmul.mubr.msk.bf16.vlgmr.msra.gmra.mrb[32].mxu1 %vm516_vm1, %v1499_v40  ;;  %v3225_v40 = vld [vmem:[%s4135_s9 + $0x48] sm:$0xff]  }
 0x53e   : > { %1781 = vmatpush1.bf16.msra.mxu1 %v2803_v61  ;;  %1812 = vmatprep.mubr.bf16.mxu1 %v3420_v6  ;;  %v3246_v61 = vld [vmem:[%s4135_s9 + $0xf0] sm:$0xff]  }
 0x53f   : > { %1782 = vmatprep.subr.bf16.mxu1 %v2812_v8  ;;  %v1626_v8 = vsub.s32 2, %v3628_v38 }
 0x541   : > { %v1627_v14 = vrot.slane %v3941_v9, %v1626_v8  ;;  %v3270_v8 = vld [vmem:[%s4135_s9 + $0x1e0] sm:$0xff]  }
 0x542   : > { %1783 = vmatpush1.bf16.msra.mxu1 %v2811_v7  ;;  %v1618_v7 = vsub.s32 0, %v3628_v38 }
 0x543   : > { %1862 = vmatprep.subr.bf16.mxu1 %v2808_v11 }
 0x544   : > { %v1619_v13 = vrot.slane %v3941_v9, %v1618_v7  ;;  %v3269_v7 = vld [vmem:[%s4135_s9 + $0x160] sm:$0xff]  }
 0x610   : > { %v1560_v42 = vpop.f32.mrb[32].mxu1 }
 0x611   : > { %v1561_v43 = vadd.f32 %v2795_v41, %v1560_v42  ;;  %v3135_v44 = vpop.f32.mrb[33].mxu1  ;;  %v3226_v41 = vld [vmem:[%s4135_s9 + $0xc8] sm:$0xff]  }
 0x612   : > { %v1563_v45 = vpop.f32.mrb[34].mxu1  ;;  %v3227_v42 = vld [vmem:[%s4135_s9 + $0x8] sm:$0xff]   ;;  %v3229_v44 = vld [vmem:[%s4135_s9 + $0x50] sm:$0xff]  }
 0x613   : > { %v3136_v46 = vpop.f32.mrb[35].mxu1  ;;  %v1566_v48 = vadd.f32 %v3323_v47, %v1561_v43  ;;  %v3228_v43 = vld [vmem:[%s4135_s9 + $0x88] sm:$0xff]   ;;  %v3230_v45 = vld [vmem:[%s4135_s9 + $0xd0] sm:$0xff]  }
 0x614   : > { %v3231_v46 = vld [vmem:[%s4135_s9 + $0x10] sm:$0xff]  }
 0x615   : > { %v1569_v49 = vsel %vm516_vm1, %v1566_v48, 0.0  ;;  %v3232_v47 = vld [vmem:[%s4135_s9 + $0x90] sm:$0xff]  }
 0x616   : > { %1570 = vadd.xlane.f32.xlu0 %v1569_v49  ;;  %v3234_v49 = vld [vmem:[%s4135_s9 + $0xd8] sm:$0xff]  }
 0x6a3   : > { %v1571_v50 = vpop.xlane.xlu0 %1570 }
 0x6a4   : > { %v1573_v51 = vmul.f32 0.03125, %v1571_v50  ;;  %v3235_v50 = vld [vmem:[%s4135_s9 + $0x18] sm:$0xff]  }
 0x6a6   : > { %v1574_v52 = vsub.f32 %v1566_v48, %v1573_v51  ;;  %v3233_v48 = vld [vmem:[%s4135_s9 + $0x58] sm:$0xff]  }
 0x6a7   : > { %v3236_v51 = vld [vmem:[%s4135_s9 + $0x98] sm:$0xff]  }
 0x6a8   : > { %v1575_v53 = vmul.f32 %v1574_v52, %v1574_v52 }
 0x6aa   : > { %v1576_v54 = vsel %vm516_vm1, %v1575_v53, 0.0  ;;  %v3238_v53 = vld [vmem:[%s4135_s9 + $0xe0] sm:$0xff]  }
 0x6ab   : > { %1577 = vadd.xlane.f32.xlu1 %v1576_v54  ;;  %v3239_v54 = vld [vmem:[%s4135_s9 + $0x20] sm:$0xff]  }
 0x738   : > { %v1578_v17 = vpop.xlane.xlu1 %1577 }
 0x739   : > { %v1579_v18 = vmul.f32 0.03125, %v1578_v17 }
 0x73b   : > { %v1580_v19 = vadd.f32 1e-05, %v1579_v18 }
 0x73d   : > { %3319 = vrsqrt.f32 %v1580_v19 }
 0x747   : > { %v3320_v20 = vpop.eup %3319 }
 0x748   : > { %v1582_v22 = vmul.f32 %v3320_v20, %v1574_v52  ;;  %v3237_v52 = vld [vmem:[%s4135_s9 + $0x60] sm:$0xff]  }
 0x74a   : > { %v1589_v24 = vmul.f32 %v2799_v21, %v1582_v22 }
 0x74c   : > { %v3826_v29 = vadd.f32 %v2800_v23, %v1589_v24 }
 0x74e   : > { %v1597_v30 = vpack.c.bf16 %v3826_v29, %v3826_v29 }
 0x750   : > { %2817 = vmatmul.mubr.msk.bf16.vlgmr.msra.gmra.mrb[36].mxu0 %vm516_vm1, %v1597_v30  ;;  %2818 = vmatmul.mubr.msk.bf16.vlgmr.msra.gmra.mrb[36].mxu1 %vm516_vm1, %v1597_v30 }
 0x751   : > { %1822 = vmatpush1.bf16.msra.mxu0 %v2805_v15  ;;  %1863 = vmatpush1.bf16.msra.mxu1 %v2807_v16  ;;  %v1623_v15 = vrot.slane %v3941_v9, %v1622_v10  ;;  %v1631_v16 = vrot.slane %v3941_v9, %v1630_v12  ;;  %v3271_v10 = vld [vmem:[%s4135_s9 + $0x120] sm:$0xff]  }
 0x752   : > { %1823 = vmatprep.subr.bf16.mxu0 %v2814_v31  ;;  %1864 = vmatprep.subr.bf16.mxu1 %v2816_v32  ;;  %v3272_v12 = vld [vmem:[%s4135_s9 + $0x1a0] sm:$0xff]  }
 0x753   : > { %1853 = vmatprep.mubr.bf16.mxu0 %v3420_v6  ;;  %1894 = vmatprep.mubr.bf16.mxu1 %v3420_v6  ;;  %v3254_v6 = vld [vmem:[%s4135_s9 + $0x1c0] sm:$0xff]  }
 0x755   : > { %1824 = vmatpush1.bf16.msra.mxu0 %v2813_v33  ;;  %1865 = vmatpush1.bf16.msra.mxu1 %v2815_v34 }
 0x756   : > { %2934 = vmatprep.subr.bf16.mxu0 %v3221_v35  ;;  %2956 = vmatprep.subr.bf16.mxu1 %v3222_v36 }
 0x758   : > { %2819 = vmatmul.mubr.msk.bf16.vlgmr.msra.gmra.mrb[40].mxu0 %vm516_vm1, %v1597_v30  ;;  %2820 = vmatmul.mubr.msk.bf16.vlgmr.msra.gmra.mrb[40].mxu1 %vm516_vm1, %v1597_v30 }
 0x759   : > { %2935 = vmatpush3.bf16.msra.mxu0 %v3223_v37  ;;  %2957 = vmatpush3.bf16.msra.mxu1 %v3224_v39  ;;  %v1639_v37 = vrot.slane %v3941_v9, %v1638_v26  ;;  %v1647_v39 = vrot.slane %v3941_v9, %v1646_v27  ;;  %v3283_v26 = vld [vmem:[%s4135_s9 + $0x138] sm:$0xff]  }
 0x75a   : > { %2936 = vmatprep.subr.bf16.mxu0 %v3225_v40  ;;  %2958 = vmatprep.subr.bf16.mxu1 %v3226_v41  ;;  %v3255_v40 = vld [vmem:[%s4135_s9 + $0x100] sm:$0xff]   ;;  %v3284_v27 = vld [vmem:[%s4135_s9 + $0x1b8] sm:$0xff]  }
 0x75b   : > { %v3256_v41 = vld [vmem:[%s4135_s9 + $0x180] sm:$0xff]  }
 0x75d   : > { %2937 = vmatpush3.bf16.msra.mxu0 %v3227_v42  ;;  %2959 = vmatpush3.bf16.msra.mxu1 %v3228_v43 }
 0x75e   : > { %2938 = vmatprep.subr.bf16.mxu0 %v3229_v44  ;;  %2960 = vmatprep.subr.bf16.mxu1 %v3230_v45  ;;  %v3257_v44 = vld [vmem:[%s4135_s9 + $0x148] sm:$0xff]  }
 0x75f   : > { %v3258_v45 = vld [vmem:[%s4135_s9 + $0x1c8] sm:$0xff]  }
 0x761   : > { %2939 = vmatpush3.bf16.msra.mxu0 %v3231_v46  ;;  %2961 = vmatpush3.bf16.msra.mxu1 %v3232_v47 }
 0x762   : > { %2940 = vmatprep.subr.bf16.mxu0 %v3233_v48  ;;  %2962 = vmatprep.subr.bf16.mxu1 %v3234_v49 }
 0x765   : > { %2941 = vmatpush3.bf16.msra.mxu0 %v3235_v50  ;;  %2963 = vmatpush3.bf16.msra.mxu1 %v3236_v51 }
 0x766   : > { %2942 = vmatprep.subr.bf16.mxu0 %v3237_v52  ;;  %2964 = vmatprep.subr.bf16.mxu1 %v3238_v53 }
 0x769   : > { %2943 = vmatpush3.bf16.msra.mxu0 %v3239_v54  ;;  %2965 = vmatpush3.bf16.msra.mxu1 %v3240_v55  ;;  %v3259_v54 = vld [vmem:[%s4135_s9 + $0x108] sm:$0xff]  }
 0x76a   : > { %2944 = vmatprep.subr.bf16.mxu0 %v3241_v56  ;;  %2966 = vmatprep.subr.bf16.mxu1 %v3242_v57  ;;  %v3260_v55 = vld [vmem:[%s4135_s9 + $0x188] sm:$0xff]  }
 0x76d   : > { %2945 = vmatpush3.bf16.msra.mxu0 %v3243_v58  ;;  %2967 = vmatpush3.bf16.msra.mxu1 %v3244_v59  ;;  %v3261_v58 = vld [vmem:[%s4135_s9 + $0x150] sm:$0xff]  }
 0x76e   : > { %2946 = vmatprep.subr.bf16.mxu0 %v3245_v60  ;;  %2968 = vmatprep.subr.bf16.mxu1 %v3246_v61  ;;  %v3262_v59 = vld [vmem:[%s4135_s9 + $0x1d0] sm:$0xff]  }
 0x771   : > { %2947 = vmatpush3.bf16.msra.mxu0 %v3247_v62  ;;  %2969 = vmatpush3.bf16.msra.mxu1 %v3248_v63 }
 0x772   : > { %2948 = vmatprep.subr.bf16.mxu0 %v3249_v0  ;;  %2970 = vmatprep.subr.bf16.mxu1 %v3250_v2  ;;  %v3263_v0 = vld [vmem:[%s4135_s9 + $0x110] sm:$0xff]  }
 0x773   : > { %v3264_v2 = vld [vmem:[%s4135_s9 + $0x190] sm:$0xff]  }
 0x775   : > { %2949 = vmatpush3.bf16.msra.mxu0 %v3251_v3  ;;  %2971 = vmatpush3.bf16.msra.mxu1 %v3252_v4  ;;  %v3265_v3 = vld [vmem:[%s4135_s9 + $0x158] sm:$0xff]  }
 0x776   : > { %2978 = vmatprep.subr.bf16.mxu0 %v3253_v5  ;;  %3000 = vmatprep.subr.bf16.mxu1 %v3254_v6  ;;  %v3266_v4 = vld [vmem:[%s4135_s9 + $0x1d8] sm:$0xff]  }
 0x777   : > { %v3267_v5 = vld [vmem:[%s4135_s9 + $0x118] sm:$0xff]  }
 0x778   : > { %v3268_v6 = vld [vmem:[%s4135_s9 + $0x198] sm:$0xff]  }
 0x823   : > { %v1773_v11 = vpop.f32.mrb[36].mxu0  ;;  %v1814_v17 = vpop.f32.mrb[36].mxu1 }
 0x824   : > { %v1774_v18 = vadd.f32 %v1773_v11, %v1619_v13  ;;  %v1815_v19 = vadd.f32 %v1814_v17, %v1627_v14  ;;  %v1775_v20 = vpop.f32.mrb[37].mxu0  ;;  %v1816_v21 = vpop.f32.mrb[37].mxu1  ;;  %v1634_v13 = vsub.s32 4, %v3628_v38  ;;  %v1642_v14 = vsub.s32 6, %v3628_v38  ;;  %v3275_v11 = vld [vmem:[%s4135_s9 + $0x128] sm:$0xff]  }
 0x825   : > { %v1776_v22 = vadd.f32 %v1775_v20, %v1623_v15  ;;  %v1817_v23 = vadd.f32 %v1816_v21, %v1631_v16  ;;  %v1777_v24 = vpop.f32.mrb[38].mxu0  ;;  %v1818_v25 = vpop.f32.mrb[38].mxu1  ;;  %v3273_v15 = vld [vmem:[%s4135_s9 + $0x168] sm:$0xff]   ;;  %v3278_v20 = vld [vmem:[%s4135_s9 + $0x1f0] sm:$0xff]  }
 0x826   : > { %v1903_v28 = vmax.f32 %v1774_v18, 0.0  ;;  %v1905_v30 = vmax.f32 %v1815_v19, 0.0  ;;  %v1778_v31 = vpop.f32.mrb[39].mxu0  ;;  %v1819_v32 = vpop.f32.mrb[39].mxu1  ;;  %v3274_v16 = vld [vmem:[%s4135_s9 + $0x1e8] sm:$0xff]   ;;  %v1635_v17 = vrot.slane %v3941_v9, %v1634_v13  ;;  %v1643_v18 = vrot.slane %v3941_v9, %v1642_v14  ;;  %v3277_v19 = vld [vmem:[%s4135_s9 + $0x170] sm:$0xff]  }
 0x827   : > { %v1904_v33 = vmax.f32 %v1776_v22, 0.0  ;;  %v1906_v34 = vmax.f32 %v1817_v23, 0.0  ;;  %v3276_v38 = vld [vmem:[%s4135_s9 + $0x1a8] sm:$0xff]   ;;  %v3279_v21 = vld [vmem:[%s4135_s9 + $0x130] sm:$0xff]   ;;  %v3281_v24 = vld [vmem:[%s4135_s9 + $0x178] sm:$0xff]  }
 0x828   : > { %v1911_v42 = vpack.c.bf16 %v1903_v28, %v1903_v28  ;;  %v1913_v43 = vpack.c.bf16 %v1905_v30, %v1905_v30  ;;  %v3280_v9 = vld [vmem:[%s4135_s9 + $0x1b0] sm:$0xff]   ;;  %v3282_v25 = vld [vmem:[%s4135_s9 + $0x1f8] sm:$0xff]  }
 0x829   : > { %v1912_v35 = vpack.c.bf16 %v1904_v33, %v1904_v33  ;;  %v1914_v36 = vpack.c.bf16 %v1906_v34, %v1906_v34 }
 0x82b   : > { %v3965_v46 = vpop.f32.mrb[40].mxu0  ;;  %v3967_v47 = vpop.f32.mrb[40].mxu1  ;;  %2470 = vmatprep.mubr.bf16.mxu0 %v1912_v35  ;;  %2510 = vmatprep.mubr.bf16.mxu1 %v1914_v36  ;;  %v2821_v35 = vld [vmem:[%s4136_s10] ss:$0 sm:$0xff] }
 0x82c   : > { %v1857_v48 = vpop.f32.mrb[41].mxu0  ;;  %v1898_v49 = vpop.f32.mrb[41].mxu1  ;;  %2471 = vmatmul.mubr.bf16.vlgmr.msra.gmra.mrb[44].mxu0 %v1911_v42  ;;  %2511 = vmatmul.mubr.bf16.vlgmr.msra.gmra.mrb[44].mxu1 %v1913_v43  ;;  %v1856_v22 = vadd.f32 %v3965_v46, %v1635_v17  ;;  %v1897_v23 = vadd.f32 %v3967_v47, %v1643_v18 }
 0x82d   : > { %v1858_v50 = vadd.f32 %v1857_v48, %v1639_v37  ;;  %v1899_v51 = vadd.f32 %v1898_v49, %v1647_v39  ;;  %2979 = vmatpush3.bf16.msra.mxu0 %v3255_v40  ;;  %3001 = vmatpush3.bf16.msra.mxu1 %v3256_v41  ;;  %v1859_v52 = vpop.f32.mrb[42].mxu0  ;;  %v1900_v53 = vpop.f32.mrb[42].mxu1 }
 0x82e   : > { %v1860_v56 = vpop.f32.mrb[43].mxu0  ;;  %v1901_v57 = vpop.f32.mrb[43].mxu1  ;;  %2980 = vmatprep.subr.bf16.mxu0 %v3257_v44  ;;  %3002 = vmatprep.subr.bf16.mxu1 %v3258_v45  ;;  %v1907_v28 = vmax.f32 %v1856_v22, 0.0  ;;  %v1909_v30 = vmax.f32 %v1897_v23, 0.0 }
 0x82f   : > { %v1908_v60 = vmax.f32 %v1858_v50, 0.0  ;;  %v1910_v61 = vmax.f32 %v1899_v51, 0.0 }
 0x830   : > { %v1915_v31 = vpack.c.bf16 %v1907_v28, %v1907_v28  ;;  %v1917_v32 = vpack.c.bf16 %v1909_v30, %v1909_v30 }
 0x831   : > { %v1916_v62 = vpack.c.bf16 %v1908_v60, %v1908_v60  ;;  %v1918_v63 = vpack.c.bf16 %v1910_v61, %v1910_v61  ;;  %2981 = vmatpush3.bf16.msra.mxu0 %v3259_v54  ;;  %3003 = vmatpush3.bf16.msra.mxu1 %v3260_v55 }
 0x832   : > { %2982 = vmatprep.subr.bf16.mxu0 %v3261_v58  ;;  %3004 = vmatprep.subr.bf16.mxu1 %v3262_v59 }
 0x833   : > { %2550 = vmatprep.mubr.bf16.mxu0 %v1916_v62  ;;  %2590 = vmatprep.mubr.bf16.mxu1 %v1918_v63 }
 0x835   : > { %2983 = vmatpush3.bf16.msra.mxu0 %v3263_v0  ;;  %3005 = vmatpush3.bf16.msra.mxu1 %v3264_v2 }
 0x836   : > { %2984 = vmatprep.subr.bf16.mxu0 %v3265_v3  ;;  %3006 = vmatprep.subr.bf16.mxu1 %v3266_v4  ;;  %v3285_v3 = vld [vmem:[%s4139_s13] sm:$0xff]  }
 0x839   : > { %2985 = vmatpush3.bf16.msra.mxu0 %v3267_v5  ;;  %3007 = vmatpush3.bf16.msra.mxu1 %v3268_v6 }
 0x83a   : > { %2986 = vmatprep.subr.bf16.mxu0 %v3269_v7  ;;  %3008 = vmatprep.subr.bf16.mxu1 %v3270_v8  ;;  %v2886_v8 = vld [vmem:[%s4137_s11] ss:$0 sm:$0xff] }
 0x83d   : > { %2987 = vmatpush3.bf16.msra.mxu0 %v3271_v10  ;;  %3009 = vmatpush3.bf16.msra.mxu1 %v3272_v12 }
 0x83e   : > { %2988 = vmatprep.subr.bf16.mxu0 %v3273_v15  ;;  %3010 = vmatprep.subr.bf16.mxu1 %v3274_v16  ;;  %v2888_v15 = vld [vmem:[%s4140_s14] ss:$0 sm:$0xff] }
 0x841   : > { %2989 = vmatpush3.bf16.msra.mxu0 %v3275_v11  ;;  %3011 = vmatpush3.bf16.msra.mxu1 %v3276_v38 }
 0x842   : > { %2990 = vmatprep.subr.bf16.mxu0 %v3277_v19  ;;  %3012 = vmatprep.subr.bf16.mxu1 %v3278_v20 }
 0x845   : > { %2991 = vmatpush3.bf16.msra.mxu0 %v3279_v21  ;;  %3013 = vmatpush3.bf16.msra.mxu1 %v3280_v9 }
 0x846   : > { %2992 = vmatprep.subr.bf16.mxu0 %v3281_v24  ;;  %3014 = vmatprep.subr.bf16.mxu1 %v3282_v25 }
 0x849   : > { %2993 = vmatpush3.bf16.msra.mxu0 %v3283_v26  ;;  %3015 = vmatpush3.bf16.msra.mxu1 %v3284_v27 }
 0x84a   : > { %3137 = vmatprep.subr.bf16.mxu0 %v3388_v1 }
 0x84c   : > { %2551 = vmatmul.mubr.bf16.vlgmr.msra.gmra.mrb[48].mxu0 %v1915_v31  ;;  %2591 = vmatmul.mubr.bf16.vlgmr.msra.gmra.mrb[48].mxu1 %v1917_v32 }
 0x84d   : > { %3141 = vmatprep.mubr.msk.bf16.mxu0 %vm3389_vm0, %v3388_v1  ;;  %3138 = vmatpush3.bf16.msra.mxu0 %v3285_v3 }
 0x84e   : > { %3139 = vmatprep.subr.bf16.mxu0 %v3388_v1  ;;  %v2887_v1 = vld [vmem:[%s4138_s12] ss:$0 sm:$0xff] }
 0x8ff   : > { %v2950_v33 = vpop.f32.mrb[44].mxu0  ;;  %v2972_v34 = vpop.f32.mrb[44].mxu1 }
 0x900   : > { %v2951_v36 = vpop.f32.mrb[45].mxu0  ;;  %v2973_v37 = vpop.f32.mrb[45].mxu1 }
 0x901   : > { %v2952_v39 = vadd.f32 %v2951_v36, %v2950_v33  ;;  %v2974_v40 = vadd.f32 %v2973_v37, %v2972_v34  ;;  %v2953_v41 = vpop.f32.mrb[46].mxu0  ;;  %v2975_v42 = vpop.f32.mrb[46].mxu1 }
 0x902   : > { %v2954_v43 = vpop.f32.mrb[47].mxu0  ;;  %v2976_v44 = vpop.f32.mrb[47].mxu1 }
 0x903   : > { %v2473_v45 = vadd.f32 %v2952_v39, %v2821_v35 }
 0x905   : > { %v2513_v46 = vadd.f32 %v2974_v40, %v2473_v45 }
 0x91f   : > { %v2994_v47 = vpop.f32.mrb[48].mxu0  ;;  %v3016_v48 = vpop.f32.mrb[48].mxu1 }
 0x920   : > { %v2995_v49 = vpop.f32.mrb[49].mxu0  ;;  %v3017_v50 = vpop.f32.mrb[49].mxu1 }
 0x921   : > { %v2996_v51 = vadd.f32 %v2995_v49, %v2994_v47  ;;  %v3018_v52 = vadd.f32 %v3017_v50, %v3016_v48  ;;  %v2997_v53 = vpop.f32.mrb[50].mxu0  ;;  %v3019_v54 = vpop.f32.mrb[50].mxu1 }
 0x922   : > { %v2998_v55 = vpop.f32.mrb[51].mxu0  ;;  %v3020_v56 = vpop.f32.mrb[51].mxu1 }
 0x923   : > { %v2553_v57 = vadd.f32 %v2996_v51, %v2513_v46 }
 0x925   : > { %v2593_v58 = vadd.f32 %v3018_v52, %v2553_v57 }
 0x927   : > { %v2598_v59 = vadd.f32 %v2593_v58, %v3826_v29  ;;  %v3286_v29 = vld [vmem:[%s4139_s13 + $0x8] sm:$0xff]  }
 0x928   : > { %3140 = vmatpush3.bf16.msra.mxu0 %v3286_v29 }
 0x929   : > { %v2601_v60 = vsel %vm516_vm1, %v2598_v59, 0.0 }
 0x92a   : > { %2602 = vadd.xlane.f32.xlu0 %v2601_v60 }
 0x9b7   : > { %v2603_v61 = vpop.xlane.xlu0 %2602 }
 0x9b8   : > { %v2604_v62 = vmul.f32 0.03125, %v2603_v61 }
 0x9ba   : > { %v2605_v63 = vsub.f32 %v2598_v59, %v2604_v62 }
 0x9bc   : > { %v2606_v0 = vmul.f32 %v2605_v63, %v2605_v63 }
 0x9be   : > { %v2607_v2 = vsel %vm516_vm1, %v2606_v0, 0.0 }
 0x9bf   : > { %2608 = vadd.xlane.f32.xlu0 %v2607_v2 }
 0xa4c   : > { %v2609_v4 = vpop.xlane.xlu0 %2608 }
 0xa4d   : > { %v2610_v5 = vmul.f32 0.03125, %v2609_v4 }
 0xa4f   : > { %v2611_v6 = vadd.f32 1e-05, %v2610_v5 }
 0xa51   : > { %3321 = vrsqrt.f32 %v2611_v6 }
 0xa5b   : > { %v3322_v7 = vpop.eup %3321 }
 0xa5c   : > { %v2613_v10 = vmul.f32 %v3322_v7, %v2605_v63 }
 0xa5e   : > { %v2620_v12 = vmul.f32 %v2886_v8, %v2613_v10 }
 0xa60   : > { %v2627_v13 = vadd.f32 %v2887_v1, %v2620_v12 }
 0xa62   : > { %v2628_v14 = vpack.c.bf16 %v2627_v13, %v2627_v13 }
 0xa64   : > { %3142 = vmatmul.mubr.msk.bf16.vlgmr.msra.gmra.mrb[52].mxu0 %vm516_vm1, %v2628_v14 }
 0xb37   : > { %v2689_v16 = vpop.f32.mrb[52].mxu0 }
 0xb38   : > { %v2690_v11 = vadd.f32 %v2888_v15, %v2689_v16  ;;  %v3143_v38 = vpop.f32.mrb[53].mxu0 }
 0xb39   : > { %v2692_v17 = vpop.f32.mrb[54].mxu0 }
 0xb3a   : > { %2695 = vst [vmem:[%s485_s26] sm:$0xff] %v2690_v11  ;;  %v3144_v18 = vpop.f32.mrb[55].mxu0 }
 0xb3b   : > { %3337 = shalt.err (!%p3334_p3)
}
 0xb3c   : > { %s3338_s23 = scalar_lea.hbm %s4084_s17, 128  ;;  %s3342_s27 = scalar_lea.hbm %s4141_s15, 256 }
 0xb3d   : > { %p3339_p4 = scmp.ne.s32.totalorder %s4084_s17, %s3338_s23  ;;  %p3343_p9 = scmp.lt.u32.totalorder %s4084_s17, %s4141_s15 }
 0xb3e   : > { %p3344_p10 = scmp.lt.u32.totalorder %s3342_s27, %s3338_s23  ;;  %p3346_p12 = scmp.lt.u32.totalorder %s3338_s23, %s4084_s17 }
 0xb3f   : > { %p3340_p7 = pnand %p3339_p4, %p3540_p5 }
 0xb40   : > { %p3345_p11 = por %p3344_p10, %p3343_p9 }
 0xb41   : > { %p3341_p8 = pneg %p3340_p7 }
 0xb42   : > { %p3347_p13 = por %p3346_p12, %p3345_p11 }
 0xb44   : > { %p3348_p0 = pnand %p3347_p13, %p3341_p8 }
 0xb46   : > { %3351 = shalt.err (!%p3348_p0)
}
 0xb47   : > { %3145 = dma.vmem_to_hbm [thread:$0]  (%p3540_p5), %s4086_s30, 128, %s4084_s17, %s2697_s1  }
 0xb48 PF: > { %p3151_p1 = scmp.ge.s32.totalorder %s3386_s21, 2  ;;  %s2722_s22 = sand.u32 1, %s3374_s18  }
 0xb49   : > { %s2723_s16 = scalar_lea.sflag [#allocation3], %s2722_s22 }
 0xb4a   : > { %p3148_p2 = pnand %p3151_p1, %p3544_p6 }
 0xb4c   : > { %3369 = dma.done.wait (!%p3148_p2), %s2723_s16, 128  }
 0xb4d   : > { %3371 = vsyncadd (!%p3148_p2), %s2723_s16, 4294967168  ;;  %s4153_s23 = sld [smem:[#allocation5_spill]]  ;;  %p25_p3 = scmp.ge.s32.totalorder %s3527_s24, 4  }
 0xb4e   : > { %s4154_s18 = smov %s3378_s19  ;;  %s4155_s19 = smov %s3382_s20 }
 0xb4f   : > { %s4157_s21 = smov %s3527_s24  ;;  %27 = sbr.rel (!%p25_p3) target bundleno = 7 (0x7), region = 115 }
 0xb53   : > { %s4156_s20 = smov %s4153_s23 }
 0xb56   :  { %2728 = vsyncpa [#allocation3], 1 }
 0xb57   :  { %2730 = vsyncpa [#allocation3 + $0x1], 1 }

</bundles_post_ra>
